<compile_context>
chip_gen: v6e
topology: v6e:2x2x1
jax: 0.10.0
libtpu: 0.0.40
codegen_flags: <defaults>
</compile_context>

<pallas_src>
import functools

import jax
import jax.numpy as jnp
from jax.experimental import pallas as pl
from jax.experimental.pallas import tpu as pltpu


def fold_bn(gamma, beta, mean, var, eps=1e-5):
    """Fold inference-mode BatchNorm into a per-channel scale/shift."""
    scale = gamma / jnp.sqrt(var + eps)
    shift = beta - mean * scale
    return scale, shift


@functools.lru_cache(maxsize=1)
def _vmem_limit():
    """Generation-aware scoped-VMEM budget (v5e/v6e: 128 MiB phys, v7x: 64 MiB)."""
    try:
        info = pltpu.get_tpu_info()
        cap = None
        for name in ("vmem_capacity_bytes", "vmem_size_bytes", "vmem_bytes"):
            cap = getattr(info, name, None)
            if cap:
                break
        if not cap:
            raise ValueError("unknown VMEM capacity")
        return int(max(32 << 20, min(96 << 20, (int(cap) * 3) // 4)))
    except Exception:
        return 48 << 20


def _spatial_tile(S):
    """Largest legal spatial tile: full S if small, else a multiple of 128.

    Bigger tiles amortize the ~0.35us per-grid-step overhead; cap lower on
    64 MiB-VMEM parts (v7x) than on 128 MiB parts (v5e/v6e).
    """
    max_ts = 2048 if _vmem_limit() >= (64 << 20) else 1024
    if S <= max_ts:
        return S
    return max(128, (max_ts // 128) * 128)


# ---------------------------------------------------------------------------
# Kernel 1 (grid (N, spatial tiles)): single pass over x.
#   pre  = ReLU(BN(W_pre x + b_pre))            -> bf16, lane-dense tiles
#   xbar = mean_T(x)                            -> accumulated across tiles via a
#          masked 0/1 joint-fold matmul (remainder tiles contribute exact zeros).
# (mean_T commutes with the 1x1 convs conv1/conv2, so kernel 2 only needs xbar.)
# ---------------------------------------------------------------------------
def _pre_xbar_kernel(x_ref, wp_ref, sp_ref, tp_ref, fold_ref, pre_ref, xbar_ref,
                     *, S, T):
    j = pl.program_id(1)
    nj = pl.num_programs(1)
    ts = x_ref.shape[-1]

    x = x_ref[0]                                                     # (Cin, ts) f32

    # pre path: 1x1 conv (MXU, bf16 operands / f32 accum) + folded BN + ReLU.
    yp = jnp.dot(wp_ref[...], x.astype(jnp.bfloat16),
                 preferred_element_type=jnp.float32)                 # (KM, ts)
    pre_ref[0] = jnp.maximum(yp * sp_ref[...] + tp_ref[...], 0.0).astype(pre_ref.dtype)

    # T-mean fold: zero out padded/out-of-range columns, then contract with the
    # host-built 0/1 fold matrix (also zero beyond S) -> partial (Cin, V) sums.
    col = jax.lax.broadcasted_iota(jnp.int32, x.shape, 1) + j * ts
    xm = jnp.where(col < S, x, 0.0)
    partial = jnp.dot(xm, fold_ref[...], preferred_element_type=jnp.float32)

    @pl.when(j == 0)
    def _():
        xbar_ref[...] = jnp.zeros_like(xbar_ref)

    xbar_ref[0] += partial

    @pl.when(j == nj - 1)
    def _():
        xbar_ref[0] = xbar_ref[0] * (1.0 / T)


def pre_and_mean(x3, wp_t, sp, tp, T, V):
    N, Cin, S = x3.shape
    KM = wp_t.shape[0]
    ts = _spatial_tile(S)
    nj = pl.cdiv(S, ts)

    # Host-built fold matrix: fold[s, v] = 1 iff s < S and s % V == v.
    # Padded rows (>= S) are exact zeros so remainder tiles cannot corrupt xbar.
    idx = jnp.arange(nj * ts)
    fold = ((idx[:, None] % V) == jnp.arange(V)[None, :]) & (idx[:, None] < S)
    fold = fold.astype(jnp.float32)

    kernel = functools.partial(_pre_xbar_kernel, S=S, T=T)
    return pl.pallas_call(
        kernel,
        out_shape=(jax.ShapeDtypeStruct((N, KM, S), jnp.bfloat16),
                   jax.ShapeDtypeStruct((N, Cin, V), jnp.float32)),
        grid=(N, nj),
        in_specs=[
            pl.BlockSpec((1, Cin, ts), lambda n, j: (n, 0, j)),      # x
            pl.BlockSpec((KM, Cin), lambda n, j: (0, 0)),            # w_pre^T (bf16)
            pl.BlockSpec((KM, 1), lambda n, j: (0, 0)),              # BN scale
            pl.BlockSpec((KM, 1), lambda n, j: (0, 0)),              # BN shift (+bias)
            pl.BlockSpec((ts, V), lambda n, j: (j, 0)),              # fold matrix
        ],
        out_specs=(
            pl.BlockSpec((1, KM, ts), lambda n, j: (n, 0, j)),       # pre (bf16)
            pl.BlockSpec((1, Cin, V), lambda n, j: (n, 0, 0)),       # xbar (resident)
        ),
        compiler_params=pltpu.CompilerParams(
            dimension_semantics=("parallel", "arbitrary"),
            vmem_limit_bytes=_vmem_limit()),
    )(x3, wp_t, sp, tp, fold)


# ---------------------------------------------------------------------------
# Kernel 2 (per batch element n, all K subsets at once):
#   x1m/x2m = conv1/conv2 applied to mean_T(x)     (1x1 conv commutes with mean)
#   ctr     = tanh(x1m[.,u] - x2m[.,w]) * alpha                 (K*mid, V, V)
#   ada     = softmax_u(sum_c x1m[k,c,u] x2m[k,c,w]) * beta     (K, V, V)
#   gsum    = ctr + ada ;  acomb = gsum + A
#   y       = einsum('btv,bvw->btw', pre, acomb)   batched over b = K*mid (MXU)
# ---------------------------------------------------------------------------
def _graph_apply_kernel(alpha_ref, beta_ref, xbar_ref, w1_ref, w2_ref, b1_ref,
                        b2_ref, a_ref, pre_ref, y_ref, gsum_ref, acomb_ref):
    _, KM, T, V = pre_ref.shape
    K = a_ref.shape[0]
    mid = KM // K
    alpha = alpha_ref[0]
    beta = beta_ref[0]

    # conv1 / conv2 applied to the T-mean of x (graph math kept in f32).
    xb = xbar_ref[0]                                                     # (Cin, V)
    x1m = jnp.dot(w1_ref[...], xb, preferred_element_type=jnp.float32) + b1_ref[...]
    x2m = jnp.dot(w2_ref[...], xb, preferred_element_type=jnp.float32) + b2_ref[...]

    # ctr graph, all K*mid channels at once.
    ctr = jnp.tanh(x1m[:, :, None] - x2m[:, None, :]) * alpha            # (KM, V, V)

    # ada graph: per-subset contraction over mid on the MXU, softmax over u.
    x1r = x1m.reshape(K, mid, V)
    x2r = x2m.reshape(K, mid, V)
    s = jax.lax.dot_general(jnp.swapaxes(x1r, 1, 2), x2r,
                            (((2,), (1,)), ((0,), (0,))),
                            preferred_element_type=jnp.float32)           # (K, V, V)
    e = jnp.exp(s - jnp.max(s, axis=1, keepdims=True))                    # softmax(-2)
    ada = (e / jnp.sum(e, axis=1, keepdims=True)) * beta

    ada_full = jnp.broadcast_to(ada[:, None], (K, mid, V, V)).reshape(KM, V, V)
    a_full = jnp.broadcast_to(a_ref[...][:, None], (K, mid, V, V)).reshape(KM, V, V)
    gsum = ctr + ada_full
    acomb = gsum + a_full
    gsum_ref[0] = gsum
    acomb_ref[0] = acomb

    # Graph apply: one batched MXU matmul over all K*mid channels (bf16 operands).
    y = jax.lax.dot_general(pre_ref[0], acomb.astype(jnp.bfloat16),
                            (((2,), (1,)), ((0,), (0,))),
                            preferred_element_type=jnp.float32)           # (KM, T, V)
    y_ref[0] = y.astype(y_ref.dtype)


def graph_apply(xbar, pre4, a_base, alpha1, beta1, w1_t, w2_t, b1, b2):
    N, Cin, V = xbar.shape
    _, KM, T, _ = pre4.shape
    K = a_base.shape[0]
    return pl.pallas_call(
        _graph_apply_kernel,
        out_shape=(jax.ShapeDtypeStruct((N, KM, T, V), jnp.bfloat16),
                   jax.ShapeDtypeStruct((N, KM, V, V), jnp.float32),
                   jax.ShapeDtypeStruct((N, KM, V, V), jnp.float32)),
        grid=(N,),
        in_specs=[
            pl.BlockSpec(memory_space=pltpu.MemorySpace.SMEM),            # alpha
            pl.BlockSpec(memory_space=pltpu.MemorySpace.SMEM),            # beta
            pl.BlockSpec((1, Cin, V), lambda n: (n, 0, 0)),               # mean_T(x)
            pl.BlockSpec((KM, Cin), lambda n: (0, 0)),                    # w1^T
            pl.BlockSpec((KM, Cin), lambda n: (0, 0)),                    # w2^T
            pl.BlockSpec((KM, 1), lambda n: (0, 0)),                      # b1
            pl.BlockSpec((KM, 1), lambda n: (0, 0)),                      # b2
            pl.BlockSpec((K, V, V), lambda n: (0, 0, 0)),                 # A
            pl.BlockSpec((1, KM, T, V), lambda n: (n, 0, 0, 0)),          # pre (bf16)
        ],
        out_specs=(
            pl.BlockSpec((1, KM, T, V), lambda n: (n, 0, 0, 0)),
            pl.BlockSpec((1, KM, V, V), lambda n: (n, 0, 0, 0)),
            pl.BlockSpec((1, KM, V, V), lambda n: (n, 0, 0, 0)),
        ),
        compiler_params=pltpu.CompilerParams(
            dimension_semantics=("parallel",),
            vmem_limit_bytes=_vmem_limit()),
    )(alpha1, beta1, xbar, w1_t, w2_t, b1, b2, a_base, pre4)


# ---------------------------------------------------------------------------
# Kernel 3 (grid (N, spatial tiles), lane-dense): post 1x1 conv + folded final BN
# + residual (down 1x1 conv + folded BN recomputed from x) + ReLU.
# ---------------------------------------------------------------------------
def _post_kernel(y_ref, x_ref, wpost_ref, wdown_ref, sf_ref, tf_ref, sd_ref,
                 td_ref, out_ref):
    post = jnp.dot(wpost_ref[...], y_ref[0], preferred_element_type=jnp.float32)
    res = jnp.dot(wdown_ref[...], x_ref[0].astype(jnp.bfloat16),
                  preferred_element_type=jnp.float32)
    out_ref[0] = jnp.maximum(post * sf_ref[...] + tf_ref[...]
                             + res * sd_ref[...] + td_ref[...], 0.0)


def post_down_bn_add_relu(y3, x3, wpost_t, wdown_t, sf, tf, sd, td):
    N, KM, S = y3.shape
    Cin = x3.shape[1]
    Cout = wpost_t.shape[0]
    ts = _spatial_tile(S)
    return pl.pallas_call(
        _post_kernel,
        out_shape=jax.ShapeDtypeStruct((N, Cout, S), jnp.float32),
        grid=(N, pl.cdiv(S, ts)),
        in_specs=[
            pl.BlockSpec((1, KM, ts), lambda n, j: (n, 0, j)),            # y (bf16)
            pl.BlockSpec((1, Cin, ts), lambda n, j: (n, 0, j)),           # x
            pl.BlockSpec((Cout, KM), lambda n, j: (0, 0)),                # w_post^T
            pl.BlockSpec((Cout, Cin), lambda n, j: (0, 0)),               # w_down^T
            pl.BlockSpec((Cout, 1), lambda n, j: (0, 0)),                 # final BN scale
            pl.BlockSpec((Cout, 1), lambda n, j: (0, 0)),                 # final BN shift
            pl.BlockSpec((Cout, 1), lambda n, j: (0, 0)),                 # down BN scale
            pl.BlockSpec((Cout, 1), lambda n, j: (0, 0)),                 # down BN shift
        ],
        out_specs=pl.BlockSpec((1, Cout, ts), lambda n, j: (n, 0, j)),
        compiler_params=pltpu.CompilerParams(
            dimension_semantics=("parallel", "parallel"),
            vmem_limit_bytes=_vmem_limit()),
    )(y3, x3, wpost_t, wdown_t, sf, tf, sd, td)


# ---------------------------------------------------------------------------
# Glue: full unit_gcn forward (ctr='T', ada='T', subset_wise=False,
#       ada_act='softmax', ctr_act='tanh', norm='BN', act='ReLU').
# ---------------------------------------------------------------------------
def unit_gcn_forward(x, p):
    N, Cin, T, V = x.shape
    KM = p["w_pre"].shape[1]
    Cout = p["w_post"].shape[1]
    S = T * V

    x3 = x.reshape(N, Cin, S)                    # NCHW is already channel-first: free

    # Fold conv bias + inference BN into per-channel scale/shift.
    s_d, t_d = fold_bn(*p["bn_down"]);  t_d = p["b_down"] * s_d + t_d
    s_p, t_p = fold_bn(*p["bn_pre"]);   t_p = p["b_pre"] * s_p + t_p
    s_f, t_f = fold_bn(*p["bn_final"]); t_f = p["b_post"] * s_f + t_f

    # Kernel 1: x read once -> pre (bf16) + mean_T(x).
    pre, xbar = pre_and_mean(
        x3,
        jnp.transpose(p["w_pre"]).astype(jnp.bfloat16),
        s_p.reshape(KM, 1), t_p.reshape(KM, 1), T, V)

    pre4 = pre.reshape(N, KM, T, V)              # free (row-major bitcast in HBM)

    # Kernel 2: graph construction + graph apply.
    y, gsum, acomb = graph_apply(
        xbar, pre4, p["A"], p["alpha"][:1], p["beta"][:1],
        jnp.transpose(p["w1"]), jnp.transpose(p["w2"]),
        p["b1"].reshape(KM, 1), p["b2"].reshape(KM, 1))

    # Kernel 3: post conv + final BN + recomputed down residual + ReLU.
    out3 = post_down_bn_add_relu(
        y.reshape(N, KM, S), x3,                 # free bitcast
        jnp.transpose(p["w_post"]).astype(jnp.bfloat16),
        jnp.transpose(p["w_down"]).astype(jnp.bfloat16),
        s_f.reshape(Cout, 1), t_f.reshape(Cout, 1),
        s_d.reshape(Cout, 1), t_d.reshape(Cout, 1))

    out = out3.reshape(N, Cout, T, V)            # already NCHW: free
    return out, [gsum, acomb]                    # (N, K*mid, V, V) each


# ---------------------------------------------------------------------------
# Pure-JAX reference (mirrors the PyTorch forward) for correctness check.
# ---------------------------------------------------------------------------
def reference_forward(x, p):
    N, Cin, T, V = x.shape
    K = p["A"].shape[0]
    mid = p["w_pre"].shape[1] // K
    eps = 1e-5

    def conv(xn, w, b):
        return jnp.einsum('nctv,co->notv', xn, w) + b[None, :, None, None]

    def bn(xn, prm):
        g, bta, m, v = prm
        return ((xn - m[None, :, None, None]) / jnp.sqrt(v[None, :, None, None] + eps)
                * g[None, :, None, None] + bta[None, :, None, None])

    res = bn(conv(x, p["w_down"], p["b_down"]), p["bn_down"])
    pre = jnp.maximum(bn(conv(x, p["w_pre"], p["b_pre"]), p["bn_pre"]), 0.0)
    pre_x = pre.reshape(N, K, mid, T, V)
    x1 = conv(x, p["w1"], p["b1"]).reshape(N, K, mid, T, V).mean(axis=3, keepdims=True)
    x2_ = conv(x, p["w2"], p["b2"]).reshape(N, K, mid, T, V).mean(axis=3, keepdims=True)
    A = p["A"][None, :, None, None]
    ctr_g = jnp.tanh(x1[..., :, None] - x2_[..., None, :]) * p["alpha"][0]
    A = ctr_g + A
    ada = jnp.einsum('nkctv,nkctw->nktvw', x1, x2_)[:, :, None]
    ada = jax.nn.softmax(ada, axis=-2) * p["beta"][0]
    A = (ada + A).squeeze(3)                                             # (N,K,mid,V,V)
    y = jnp.einsum('nkctv,nkcvw->nkctw', pre_x, A).reshape(N, K * mid, T, V)
    post = conv(y, p["w_post"], p["b_post"])
    out = jnp.maximum(bn(post, p["bn_final"]) + res, 0.0)
    get_gcl = (ctr_g + ada).squeeze(3).reshape(N, K * mid, V, V)
    all_gcl = A.reshape(N, K * mid, V, V)
    return out, [get_gcl, all_gcl]


if __name__ == "__main__":
    N, Cin, Cout, T, V, K = 2, 4, 8, 8, 16, 3
    ratio = 0.25
    mid = int(ratio * Cout)

    key = jax.random.PRNGKey(0)
    ks = jax.random.split(key, 24)

    def nrm(k, shape, scale=0.1):
        return scale * jax.random.normal(k, shape, jnp.float32)

    def bn_params(k0, k1, k2, k3, c):
        return (1.0 + nrm(k0, (c,)),                      # gamma
                nrm(k1, (c,)),                            # beta
                nrm(k2, (c,)),                            # running_mean
                1.0 + 0.1 * jnp.abs(jax.random.normal(k3, (c,), jnp.float32)))  # var

    params = {
        "A": nrm(ks[0], (K, V, V), 0.5),
        "w_pre": nrm(ks[1], (Cin, mid * K)), "b_pre": nrm(ks[2], (mid * K,)),
        "bn_pre": bn_params(ks[3], ks[4], ks[5], ks[6], mid * K),
        "w1": nrm(ks[7], (Cin, mid * K)), "b1": nrm(ks[8], (mid * K,)),
        "w2": nrm(ks[9], (Cin, mid * K)), "b2": nrm(ks[10], (mid * K,)),
        "w_post": nrm(ks[11], (mid * K, Cout)), "b_post": nrm(ks[12], (Cout,)),
        "w_down": nrm(ks[13], (Cin, Cout)), "b_down": nrm(ks[14], (Cout,)),
        "bn_down": bn_params(ks[15], ks[16], ks[17], ks[18], Cout),
        "bn_final": bn_params(ks[19], ks[20], ks[21], ks[22], Cout),
        # PyTorch inits alpha/beta to zeros; use small nonzero deterministic
        # values so the ctr/ada graph paths are actually exercised.
        "alpha": jnp.full((K,), 0.1, jnp.float32),
        "beta": jnp.full((K,), 0.2, jnp.float32),
    }

    x = jax.random.normal(ks[23], (N, Cin, T, V), jnp.float32)

    out, gcl = jax.jit(unit_gcn_forward)(x, params)
    jax.block_until_ready(out)
    jax.block_until_ready(gcl)

    ref_out, ref_gcl = reference_forward(x, params)
    assert out.shape == (N, Cout, T, V)
    assert gcl[0].shape == (N, K * mid, V, V) and gcl[1].shape == (N, K * mid, V, V)
    # The main path uses bf16 MXU operands (f32 accumulation) -> looser tolerance
    # vs. the pure-f32 reference; the graph path is f32 -> tight tolerance.
    assert jnp.allclose(out, ref_out, atol=5e-2, rtol=5e-2)
    assert jnp.allclose(gcl[0], ref_gcl[0], atol=2e-3, rtol=2e-3)
    assert jnp.allclose(gcl[1], ref_gcl[1], atol=2e-3, rtol=2e-3)

    print("KERNEL_OK")
</pallas_src>

<mosaic_0001>
module attributes {stable_mosaic.version = 11 : i64} {
  func.func @_pre_xbar_kernel(%arg0: i32, %arg1: i32, %arg2: memref<1x4x128xf32, #tpu.memory_space<vmem>>, %arg3: memref<6x4xbf16, #tpu.memory_space<vmem>>, %arg4: memref<6x1xf32, #tpu.memory_space<vmem>>, %arg5: memref<6x1xf32, #tpu.memory_space<vmem>>, %arg6: memref<128x16xf32, #tpu.memory_space<vmem>>, %arg7: memref<1x6x128xbf16, #tpu.memory_space<vmem>>, %arg8: memref<1x4x16xf32, #tpu.memory_space<vmem>>) attributes {dimension_semantics = [#tpu.dimension_semantics<parallel>, #tpu.dimension_semantics<arbitrary>], iteration_bounds = array<i64: 2, 1>, scalar_prefetch = 0 : i64, scratch_operands = 0 : i64, tpu.core_type = #tpu.core_type<tc>, window_params = [{transform_indices = @transform_0, window_bounds = array<i64: 1, 4, 128>}, {pipeline_mode = #tpu.pipeline_mode<synchronous>, transform_indices = @transform_1, window_bounds = array<i64: 6, 4>}, {pipeline_mode = #tpu.pipeline_mode<synchronous>, transform_indices = @transform_2, window_bounds = array<i64: 6, 1>}, {pipeline_mode = #tpu.pipeline_mode<synchronous>, transform_indices = @transform_3, window_bounds = array<i64: 6, 1>}, {transform_indices = @transform_4, window_bounds = array<i64: 128, 16>}, {transform_indices = @transform_5, window_bounds = array<i64: 1, 6, 128>}, {transform_indices = @transform_6, window_bounds = array<i64: 1, 4, 16>}]} {
    %c0 = arith.constant 0 : index
    %c0_0 = arith.constant 0 : index
    %c0_1 = arith.constant 0 : index
    %0 = vector.load %arg2[%c0, %c0_0, %c0_1] : memref<1x4x128xf32, #tpu.memory_space<vmem>>, vector<1x4x128xf32>
    %1 = vector.shape_cast %0 : vector<1x4x128xf32> to vector<4x128xf32>
    %c0_2 = arith.constant 0 : index
    %c0_3 = arith.constant 0 : index
    %2 = vector.load %arg3[%c0_2, %c0_3] : memref<6x4xbf16, #tpu.memory_space<vmem>>, vector<6x4xbf16>
    %3 = arith.truncf %1 : vector<4x128xf32> to vector<4x128xbf16>
    %cst = arith.constant dense<0.000000e+00> : vector<6x128xf32>
    %4 = tpu.matmul %2, %3, %cst {dimension_numbers = #tpu.dot_dimension_numbers<[1], [0], [0], [1], [0, 0, 1, 1], [], []>} : vector<6x4xbf16>, vector<4x128xbf16>, vector<6x128xf32> -> vector<6x128xf32>
    %c0_4 = arith.constant 0 : index
    %c0_5 = arith.constant 0 : index
    %5 = vector.load %arg4[%c0_4, %c0_5] : memref<6x1xf32, #tpu.memory_space<vmem>>, vector<6x1xf32>
    %6 = vector.broadcast %5 : vector<6x1xf32> to vector<6x128xf32>
    %7 = arith.mulf %4, %6 : vector<6x128xf32>
    %c0_6 = arith.constant 0 : index
    %c0_7 = arith.constant 0 : index
    %8 = vector.load %arg5[%c0_6, %c0_7] : memref<6x1xf32, #tpu.memory_space<vmem>>, vector<6x1xf32>
    %9 = vector.broadcast %8 : vector<6x1xf32> to vector<6x128xf32>
    %10 = arith.addf %7, %9 : vector<6x128xf32>
    %cst_8 = arith.constant 0.000000e+00 : f32
    %11 = vector.broadcast %cst_8 : f32 to vector<6x128xf32>
    %12 = arith.maximumf %10, %11 : vector<6x128xf32>
    %13 = arith.truncf %12 : vector<6x128xf32> to vector<6x128xbf16>
    %c0_9 = arith.constant 0 : index
    %c0_10 = arith.constant 0 : index
    %c0_11 = arith.constant 0 : index
    %14 = vector.load %arg7[%c0_9, %c0_10, %c0_11] : memref<1x6x128xbf16, #tpu.memory_space<vmem>>, vector<1x6x128xbf16>
    %15 = vector.shape_cast %14 : vector<1x6x128xbf16> to vector<6x128xbf16>
    %16 = vector.shape_cast %13 : vector<6x128xbf16> to vector<1x6x128xbf16>
    tpu.vector_store %arg7[%c0_9, %c0_10, %c0_11], %16 {strides = array<i32>} : memref<1x6x128xbf16, #tpu.memory_space<vmem>>, vector<1x6x128xbf16>,
    %17 = tpu.iota {dimensions = array<i32: 1>} : vector<4x128xi32>
    %c128_i32 = arith.constant 128 : i32
    %18 = arith.muli %arg1, %c128_i32 : i32
    %19 = vector.broadcast %18 : i32 to vector<4x128xi32>
    %20 = arith.addi %17, %19 : vector<4x128xi32>
    %c128_i32_12 = arith.constant 128 : i32
    %21 = vector.broadcast %c128_i32_12 : i32 to vector<4x128xi32>
    %22 = arith.cmpi slt, %20, %21 : vector<4x128xi32>
    %cst_13 = arith.constant 0.000000e+00 : f32
    %23 = vector.broadcast %cst_13 : f32 to vector<4x128xf32>
    %24 = arith.select %22, %1, %23 : vector<4x128xi1>, vector<4x128xf32>
    %c0_14 = arith.constant 0 : index
    %c0_15 = arith.constant 0 : index
    %25 = vector.load %arg6[%c0_14, %c0_15] : memref<128x16xf32, #tpu.memory_space<vmem>>, vector<128x16xf32>
    %cst_16 = arith.constant dense<0.000000e+00> : vector<4x16xf32>
    %26 = tpu.matmul %24, %25, %cst_16 {dimension_numbers = #tpu.dot_dimension_numbers<[1], [0], [0], [1], [0, 0, 1, 1], [], []>} : vector<4x128xf32>, vector<128x16xf32>, vector<4x16xf32> -> vector<4x16xf32>
    %c0_i32 = arith.constant 0 : i32
    %27 = arith.cmpi eq, %arg1, %c0_i32 : i32
    %28 = arith.extui %27 : i1 to i32
    %c0_i32_17 = arith.constant 0 : i32
    %29 = arith.cmpi ne, %28, %c0_i32_17 : i32
    scf.if %29 {
      %cst_26 = arith.constant 0.000000e+00 : f32
      %39 = vector.broadcast %cst_26 : f32 to vector<1x4x16xf32>
      %c0_27 = arith.constant 0 : index
      %c0_28 = arith.constant 0 : index
      %c0_29 = arith.constant 0 : index
      %40 = vector.load %arg8[%c0_27, %c0_28, %c0_29] : memref<1x4x16xf32, #tpu.memory_space<vmem>>, vector<1x4x16xf32>
      tpu.vector_store %arg8[%c0_27, %c0_28, %c0_29], %39 {strides = array<i32>} : memref<1x4x16xf32, #tpu.memory_space<vmem>>, vector<1x4x16xf32>,
    } else {
    }
    %c0_18 = arith.constant 0 : index
    %c0_19 = arith.constant 0 : index
    %c0_20 = arith.constant 0 : index
    %30 = vector.load %arg8[%c0_18, %c0_19, %c0_20] : memref<1x4x16xf32, #tpu.memory_space<vmem>>, vector<1x4x16xf32>
    %31 = vector.shape_cast %30 : vector<1x4x16xf32> to vector<4x16xf32>
    %32 = arith.addf %31, %26 : vector<4x16xf32>
    %c0_21 = arith.constant 0 : index
    %c0_22 = arith.constant 0 : index
    %c0_23 = arith.constant 0 : index
    %33 = vector.load %arg8[%c0_21, %c0_22, %c0_23] : memref<1x4x16xf32, #tpu.memory_space<vmem>>, vector<1x4x16xf32>
    %34 = vector.shape_cast %33 : vector<1x4x16xf32> to vector<4x16xf32>
    %35 = vector.shape_cast %32 : vector<4x16xf32> to vector<1x4x16xf32>
    tpu.vector_store %arg8[%c0_21, %c0_22, %c0_23], %35 {strides = array<i32>} : memref<1x4x16xf32, #tpu.memory_space<vmem>>, vector<1x4x16xf32>,
    %c0_i32_24 = arith.constant 0 : i32
    %36 = arith.cmpi eq, %arg1, %c0_i32_24 : i32
    %37 = arith.extui %36 : i1 to i32
    %c0_i32_25 = arith.constant 0 : i32
    %38 = arith.cmpi ne, %37, %c0_i32_25 : i32
    scf.if %38 {
      %c0_26 = arith.constant 0 : index
      %c0_27 = arith.constant 0 : index
      %c0_28 = arith.constant 0 : index
      %39 = vector.load %arg8[%c0_26, %c0_27, %c0_28] : memref<1x4x16xf32, #tpu.memory_space<vmem>>, vector<1x4x16xf32>
      %40 = vector.shape_cast %39 : vector<1x4x16xf32> to vector<4x16xf32>
      %cst_29 = arith.constant 1.250000e-01 : f32
      %41 = vector.broadcast %cst_29 : f32 to vector<4x16xf32>
      %42 = arith.mulf %40, %41 : vector<4x16xf32>
      %c0_30 = arith.constant 0 : index
      %c0_31 = arith.constant 0 : index
      %c0_32 = arith.constant 0 : index
      %43 = vector.load %arg8[%c0_30, %c0_31, %c0_32] : memref<1x4x16xf32, #tpu.memory_space<vmem>>, vector<1x4x16xf32>
      %44 = vector.shape_cast %43 : vector<1x4x16xf32> to vector<4x16xf32>
      %45 = vector.shape_cast %42 : vector<4x16xf32> to vector<1x4x16xf32>
      tpu.vector_store %arg8[%c0_30, %c0_31, %c0_32], %45 {strides = array<i32>} : memref<1x4x16xf32, #tpu.memory_space<vmem>>, vector<1x4x16xf32>,
    } else {
    }
    return
  }
  func.func @transform_0(%arg0: i32, %arg1: i32) -> (i32, i32, i32) {
    %c0_i32 = arith.constant 0 : i32
    %c0_i32_0 = arith.constant 0 : i32
    return %arg0, %c0_i32, %arg1 : i32, i32, i32
  }
  func.func @transform_1(%arg0: i32, %arg1: i32) -> (i32, i32) {
    %c0_i32 = arith.constant 0 : i32
    %c0_i32_0 = arith.constant 0 : i32
    %c0_i32_1 = arith.constant 0 : i32
    return %c0_i32, %c0_i32_0 : i32, i32
  }
  func.func @transform_2(%arg0: i32, %arg1: i32) -> (i32, i32) {
    %c0_i32 = arith.constant 0 : i32
    %c0_i32_0 = arith.constant 0 : i32
    %c0_i32_1 = arith.constant 0 : i32
    return %c0_i32, %c0_i32_0 : i32, i32
  }
  func.func @transform_3(%arg0: i32, %arg1: i32) -> (i32, i32) {
    %c0_i32 = arith.constant 0 : i32
    %c0_i32_0 = arith.constant 0 : i32
    %c0_i32_1 = arith.constant 0 : i32
    return %c0_i32, %c0_i32_0 : i32, i32
  }
  func.func @transform_4(%arg0: i32, %arg1: i32) -> (i32, i32) {
    %c0_i32 = arith.constant 0 : i32
    %c0_i32_0 = arith.constant 0 : i32
    return %arg1, %c0_i32 : i32, i32
  }
  func.func @transform_5(%arg0: i32, %arg1: i32) -> (i32, i32, i32) {
    %c0_i32 = arith.constant 0 : i32
    %c0_i32_0 = arith.constant 0 : i32
    return %arg0, %c0_i32, %arg1 : i32, i32, i32
  }
  func.func @transform_6(%arg0: i32, %arg1: i32) -> (i32, i32, i32) {
    %c0_i32 = arith.constant 0 : i32
    %c0_i32_0 = arith.constant 0 : i32
    %c0_i32_1 = arith.constant 0 : i32
    return %arg0, %c0_i32, %c0_i32_0 : i32, i32, i32
  }
}

module attributes {stable_mosaic.version = 11 : i64} {
  func.func @_graph_apply_kernel(%arg0: i32, %arg1: memref<1xf32, #tpu.memory_space<smem>>, %arg2: memref<1xf32, #tpu.memory_space<smem>>, %arg3: memref<1x4x16xf32, #tpu.memory_space<vmem>>, %arg4: memref<6x4xf32, #tpu.memory_space<vmem>>, %arg5: memref<6x4xf32, #tpu.memory_space<vmem>>, %arg6: memref<6x1xf32, #tpu.memory_space<vmem>>, %arg7: memref<6x1xf32, #tpu.memory_space<vmem>>, %arg8: memref<3x16x16xf32, #tpu.memory_space<vmem>>, %arg9: memref<1x6x8x16xbf16, #tpu.memory_space<vmem>>, %arg10: memref<1x6x8x16xbf16, #tpu.memory_space<vmem>>, %arg11: memref<1x6x16x16xf32, #tpu.memory_space<vmem>>, %arg12: memref<1x6x16x16xf32, #tpu.memory_space<vmem>>) attributes {dimension_semantics = [#tpu.dimension_semantics<parallel>], iteration_bounds = array<i64: 2>, scalar_prefetch = 0 : i64, scratch_operands = 0 : i64, tpu.core_type = #tpu.core_type<tc>, window_params = [{transform_indices = @transform_0, window_bounds = array<i64: 1>}, {transform_indices = @transform_1, window_bounds = array<i64: 1>}, {transform_indices = @transform_2, window_bounds = array<i64: 1, 4, 16>}, {pipeline_mode = #tpu.pipeline_mode<synchronous>, transform_indices = @transform_3, window_bounds = array<i64: 6, 4>}, {pipeline_mode = #tpu.pipeline_mode<synchronous>, transform_indices = @transform_4, window_bounds = array<i64: 6, 4>}, {pipeline_mode = #tpu.pipeline_mode<synchronous>, transform_indices = @transform_5, window_bounds = array<i64: 6, 1>}, {pipeline_mode = #tpu.pipeline_mode<synchronous>, transform_indices = @transform_6, window_bounds = array<i64: 6, 1>}, {pipeline_mode = #tpu.pipeline_mode<synchronous>, transform_indices = @transform_7, window_bounds = array<i64: 3, 16, 16>}, {transform_indices = @transform_8, window_bounds = array<i64: 1, 6, 8, 16>}, {transform_indices = @transform_9, window_bounds = array<i64: 1, 6, 8, 16>}, {transform_indices = @transform_10, window_bounds = array<i64: 1, 6, 16, 16>}, {transform_indices = @transform_11, window_bounds = array<i64: 1, 6, 16, 16>}]} {
    %c0 = arith.constant 0 : index
    %0 = memref.load %arg1[%c0] : memref<1xf32, #tpu.memory_space<smem>>
    %c0_0 = arith.constant 0 : index
    %1 = memref.load %arg2[%c0_0] : memref<1xf32, #tpu.memory_space<smem>>
    %c0_1 = arith.constant 0 : index
    %c0_2 = arith.constant 0 : index
    %c0_3 = arith.constant 0 : index
    %2 = vector.load %arg3[%c0_1, %c0_2, %c0_3] : memref<1x4x16xf32, #tpu.memory_space<vmem>>, vector<1x4x16xf32>
    %3 = vector.shape_cast %2 : vector<1x4x16xf32> to vector<4x16xf32>
    %c0_4 = arith.constant 0 : index
    %c0_5 = arith.constant 0 : index
    %4 = vector.load %arg4[%c0_4, %c0_5] : memref<6x4xf32, #tpu.memory_space<vmem>>, vector<6x4xf32>
    %cst = arith.constant dense<0.000000e+00> : vector<6x16xf32>
    %5 = tpu.matmul %4, %3, %cst {dimension_numbers = #tpu.dot_dimension_numbers<[1], [0], [0], [1], [0, 0, 1, 1], [], []>} : vector<6x4xf32>, vector<4x16xf32>, vector<6x16xf32> -> vector<6x16xf32>
    %c0_6 = arith.constant 0 : index
    %c0_7 = arith.constant 0 : index
    %6 = vector.load %arg6[%c0_6, %c0_7] : memref<6x1xf32, #tpu.memory_space<vmem>>, vector<6x1xf32>
    %7 = vector.broadcast %6 : vector<6x1xf32> to vector<6x16xf32>
    %8 = arith.addf %5, %7 : vector<6x16xf32>
    %c0_8 = arith.constant 0 : index
    %c0_9 = arith.constant 0 : index
    %9 = vector.load %arg5[%c0_8, %c0_9] : memref<6x4xf32, #tpu.memory_space<vmem>>, vector<6x4xf32>
    %cst_10 = arith.constant dense<0.000000e+00> : vector<6x16xf32>
    %10 = tpu.matmul %9, %3, %cst_10 {dimension_numbers = #tpu.dot_dimension_numbers<[1], [0], [0], [1], [0, 0, 1, 1], [], []>} : vector<6x4xf32>, vector<4x16xf32>, vector<6x16xf32> -> vector<6x16xf32>
    %c0_11 = arith.constant 0 : index
    %c0_12 = arith.constant 0 : index
    %11 = vector.load %arg7[%c0_11, %c0_12] : memref<6x1xf32, #tpu.memory_space<vmem>>, vector<6x1xf32>
    %12 = vector.broadcast %11 : vector<6x1xf32> to vector<6x16xf32>
    %13 = arith.addf %10, %12 : vector<6x16xf32>
    %14 = vector.shape_cast %8 : vector<6x16xf32> to vector<6x16x1xf32>
    %15 = vector.shape_cast %13 : vector<6x16xf32> to vector<6x1x16xf32>
    %16 = vector.broadcast %14 : vector<6x16x1xf32> to vector<6x16x16xf32>
    %17 = vector.broadcast %15 : vector<6x1x16xf32> to vector<6x16x16xf32>
    %18 = arith.subf %16, %17 : vector<6x16x16xf32>
    %19 = math.tanh %18 : vector<6x16x16xf32>
    %20 = vector.broadcast %0 : f32 to vector<6x16x16xf32>
    %21 = arith.mulf %19, %20 : vector<6x16x16xf32>
    %22 = vector.shape_cast %8 : vector<6x16xf32> to vector<3x2x16xf32>
    %23 = vector.shape_cast %13 : vector<6x16xf32> to vector<3x2x16xf32>
    %24 = tpu.transpose %22, [0, 2, 1] : vector<3x2x16xf32> -> vector<3x16x2xf32>
    %cst_13 = arith.constant dense<0.000000e+00> : vector<3x16x16xf32>
    %25 = tpu.matmul %24, %23, %cst_13 {dimension_numbers = #tpu.dot_dimension_numbers<[2], [1], [1], [2], [0, 0, 0, 1, 1, 2], [0], [0]>} : vector<3x16x2xf32>, vector<3x2x16xf32>, vector<3x16x16xf32> -> vector<3x16x16xf32>
    %cst_14 = arith.constant dense<0xFF800000> : vector<3x16xf32>
    %26 = vector.multi_reduction <maximumf>, %25, %cst_14 [1] : vector<3x16x16xf32> to vector<3x16xf32>
    %27 = vector.shape_cast %26 : vector<3x16xf32> to vector<3x1x16xf32>
    %28 = vector.broadcast %27 : vector<3x1x16xf32> to vector<3x16x16xf32>
    %29 = arith.subf %25, %28 : vector<3x16x16xf32>
    %30 = math.exp %29 : vector<3x16x16xf32>
    %cst_15 = arith.constant dense<0.000000e+00> : vector<3x16xf32>
    %31 = vector.multi_reduction <add>, %30, %cst_15 [1] : vector<3x16x16xf32> to vector<3x16xf32>
    %32 = vector.shape_cast %31 : vector<3x16xf32> to vector<3x1x16xf32>
    %33 = vector.broadcast %32 : vector<3x1x16xf32> to vector<3x16x16xf32>
    %34 = arith.divf %30, %33 : vector<3x16x16xf32>
    %35 = vector.broadcast %1 : f32 to vector<3x16x16xf32>
    %36 = arith.mulf %34, %35 : vector<3x16x16xf32>
    %37 = vector.shape_cast %36 : vector<3x16x16xf32> to vector<3x1x16x16xf32>
    %38 = vector.shape_cast %37 : vector<3x1x16x16xf32> to vector<3x1x16x16xf32>
    %39 = vector.broadcast %38 : vector<3x1x16x16xf32> to vector<3x2x16x16xf32>
    %40 = vector.shape_cast %39 : vector<3x2x16x16xf32> to vector<6x16x16xf32>
    %c0_16 = arith.constant 0 : index
    %c0_17 = arith.constant 0 : index
    %c0_18 = arith.constant 0 : index
    %41 = vector.load %arg8[%c0_16, %c0_17, %c0_18] : memref<3x16x16xf32, #tpu.memory_space<vmem>>, vector<3x16x16xf32>
    %42 = vector.shape_cast %41 : vector<3x16x16xf32> to vector<3x1x16x16xf32>
    %43 = vector.shape_cast %42 : vector<3x1x16x16xf32> to vector<3x1x16x16xf32>
    %44 = vector.broadcast %43 : vector<3x1x16x16xf32> to vector<3x2x16x16xf32>
    %45 = vector.shape_cast %44 : vector<3x2x16x16xf32> to vector<6x16x16xf32>
    %46 = arith.addf %21, %40 : vector<6x16x16xf32>
    %47 = arith.addf %46, %45 : vector<6x16x16xf32>
    %c0_19 = arith.constant 0 : index
    %c0_20 = arith.constant 0 : index
    %c0_21 = arith.constant 0 : index
    %c0_22 = arith.constant 0 : index
    %48 = vector.load %arg11[%c0_19, %c0_20, %c0_21, %c0_22] : memref<1x6x16x16xf32, #tpu.memory_space<vmem>>, vector<1x6x16x16xf32>
    %49 = vector.shape_cast %48 : vector<1x6x16x16xf32> to vector<6x16x16xf32>
    %50 = vector.shape_cast %46 : vector<6x16x16xf32> to vector<1x6x16x16xf32>
    tpu.vector_store %arg11[%c0_19, %c0_20, %c0_21, %c0_22], %50 {strides = array<i32>} : memref<1x6x16x16xf32, #tpu.memory_space<vmem>>, vector<1x6x16x16xf32>,
    %c0_23 = arith.constant 0 : index
    %c0_24 = arith.constant 0 : index
    %c0_25 = arith.constant 0 : index
    %c0_26 = arith.constant 0 : index
    %51 = vector.load %arg12[%c0_23, %c0_24, %c0_25, %c0_26] : memref<1x6x16x16xf32, #tpu.memory_space<vmem>>, vector<1x6x16x16xf32>
    %52 = vector.shape_cast %51 : vector<1x6x16x16xf32> to vector<6x16x16xf32>
    %53 = vector.shape_cast %47 : vector<6x16x16xf32> to vector<1x6x16x16xf32>
    tpu.vector_store %arg12[%c0_23, %c0_24, %c0_25, %c0_26], %53 {strides = array<i32>} : memref<1x6x16x16xf32, #tpu.memory_space<vmem>>, vector<1x6x16x16xf32>,
    %c0_27 = arith.constant 0 : index
    %c0_28 = arith.constant 0 : index
    %c0_29 = arith.constant 0 : index
    %c0_30 = arith.constant 0 : index
    %54 = vector.load %arg9[%c0_27, %c0_28, %c0_29, %c0_30] : memref<1x6x8x16xbf16, #tpu.memory_space<vmem>>, vector<1x6x8x16xbf16>
    %55 = vector.shape_cast %54 : vector<1x6x8x16xbf16> to vector<6x8x16xbf16>
    %56 = arith.truncf %47 : vector<6x16x16xf32> to vector<6x16x16xbf16>
    %cst_31 = arith.constant dense<0.000000e+00> : vector<6x8x16xf32>
    %57 = tpu.matmul %55, %56, %cst_31 {dimension_numbers = #tpu.dot_dimension_numbers<[2], [1], [1], [2], [0, 0, 0, 1, 1, 2], [0], [0]>} : vector<6x8x16xbf16>, vector<6x16x16xbf16>, vector<6x8x16xf32> -> vector<6x8x16xf32>
    %58 = arith.truncf %57 : vector<6x8x16xf32> to vector<6x8x16xbf16>
    %c0_32 = arith.constant 0 : index
    %c0_33 = arith.constant 0 : index
    %c0_34 = arith.constant 0 : index
    %c0_35 = arith.constant 0 : index
    %59 = vector.load %arg10[%c0_32, %c0_33, %c0_34, %c0_35] : memref<1x6x8x16xbf16, #tpu.memory_space<vmem>>, vector<1x6x8x16xbf16>
    %60 = vector.shape_cast %59 : vector<1x6x8x16xbf16> to vector<6x8x16xbf16>
    %61 = vector.shape_cast %58 : vector<6x8x16xbf16> to vector<1x6x8x16xbf16>
    tpu.vector_store %arg10[%c0_32, %c0_33, %c0_34, %c0_35], %61 {strides = array<i32>} : memref<1x6x8x16xbf16, #tpu.memory_space<vmem>>, vector<1x6x8x16xbf16>,
    return
  }
  func.func @transform_0(%arg0: i32) -> i32 {
    %c0_i32 = arith.constant 0 : i32
    %c0_i32_0 = arith.constant 0 : i32
    return %c0_i32 : i32
  }
  func.func @transform_1(%arg0: i32) -> i32 {
    %c0_i32 = arith.constant 0 : i32
    %c0_i32_0 = arith.constant 0 : i32
    return %c0_i32 : i32
  }
  func.func @transform_2(%arg0: i32) -> (i32, i32, i32) {
    %c0_i32 = arith.constant 0 : i32
    %c0_i32_0 = arith.constant 0 : i32
    %c0_i32_1 = arith.constant 0 : i32
    return %arg0, %c0_i32, %c0_i32_0 : i32, i32, i32
  }
  func.func @transform_3(%arg0: i32) -> (i32, i32) {
    %c0_i32 = arith.constant 0 : i32
    %c0_i32_0 = arith.constant 0 : i32
    %c0_i32_1 = arith.constant 0 : i32
    return %c0_i32, %c0_i32_0 : i32, i32
  }
  func.func @transform_4(%arg0: i32) -> (i32, i32) {
    %c0_i32 = arith.constant 0 : i32
    %c0_i32_0 = arith.constant 0 : i32
    %c0_i32_1 = arith.constant 0 : i32
    return %c0_i32, %c0_i32_0 : i32, i32
  }
  func.func @transform_5(%arg0: i32) -> (i32, i32) {
    %c0_i32 = arith.constant 0 : i32
    %c0_i32_0 = arith.constant 0 : i32
    %c0_i32_1 = arith.constant 0 : i32
    return %c0_i32, %c0_i32_0 : i32, i32
  }
  func.func @transform_6(%arg0: i32) -> (i32, i32) {
    %c0_i32 = arith.constant 0 : i32
    %c0_i32_0 = arith.constant 0 : i32
    %c0_i32_1 = arith.constant 0 : i32
    return %c0_i32, %c0_i32_0 : i32, i32
  }
  func.func @transform_7(%arg0: i32) -> (i32, i32, i32) {
    %c0_i32 = arith.constant 0 : i32
    %c0_i32_0 = arith.constant 0 : i32
    %c0_i32_1 = arith.constant 0 : i32
    %c0_i32_2 = arith.constant 0 : i32
    return %c0_i32, %c0_i32_0, %c0_i32_1 : i32, i32, i32
  }
  func.func @transform_8(%arg0: i32) -> (i32, i32, i32, i32) {
    %c0_i32 = arith.constant 0 : i32
    %c0_i32_0 = arith.constant 0 : i32
    %c0_i32_1 = arith.constant 0 : i32
    %c0_i32_2 = arith.constant 0 : i32
    return %arg0, %c0_i32, %c0_i32_0, %c0_i32_1 : i32, i32, i32, i32
  }
  func.func @transform_9(%arg0: i32) -> (i32, i32, i32, i32) {
    %c0_i32 = arith.constant 0 : i32
    %c0_i32_0 = arith.constant 0 : i32
    %c0_i32_1 = arith.constant 0 : i32
    %c0_i32_2 = arith.constant 0 : i32
    return %arg0, %c0_i32, %c0_i32_0, %c0_i32_1 : i32, i32, i32, i32
  }
  func.func @transform_10(%arg0: i32) -> (i32, i32, i32, i32) {
    %c0_i32 = arith.constant 0 : i32
    %c0_i32_0 = arith.constant 0 : i32
    %c0_i32_1 = arith.constant 0 : i32
    %c0_i32_2 = arith.constant 0 : i32
    return %arg0, %c0_i32, %c0_i32_0, %c0_i32_1 : i32, i32, i32, i32
  }
  func.func @transform_11(%arg0: i32) -> (i32, i32, i32, i32) {
    %c0_i32 = arith.constant 0 : i32
    %c0_i32_0 = arith.constant 0 : i32
    %c0_i32_1 = arith.constant 0 : i32
    %c0_i32_2 = arith.constant 0 : i32
    return %arg0, %c0_i32, %c0_i32_0, %c0_i32_1 : i32, i32, i32, i32
  }
}

module attributes {stable_mosaic.version = 11 : i64} {
  func.func @_post_kernel(%arg0: i32, %arg1: i32, %arg2: memref<1x6x128xbf16, #tpu.memory_space<vmem>>, %arg3: memref<1x4x128xf32, #tpu.memory_space<vmem>>, %arg4: memref<8x6xbf16, #tpu.memory_space<vmem>>, %arg5: memref<8x4xbf16, #tpu.memory_space<vmem>>, %arg6: memref<8x1xf32, #tpu.memory_space<vmem>>, %arg7: memref<8x1xf32, #tpu.memory_space<vmem>>, %arg8: memref<8x1xf32, #tpu.memory_space<vmem>>, %arg9: memref<8x1xf32, #tpu.memory_space<vmem>>, %arg10: memref<1x8x128xf32, #tpu.memory_space<vmem>>) attributes {dimension_semantics = [#tpu.dimension_semantics<parallel>, #tpu.dimension_semantics<parallel>], iteration_bounds = array<i64: 2, 1>, scalar_prefetch = 0 : i64, scratch_operands = 0 : i64, tpu.core_type = #tpu.core_type<tc>, window_params = [{transform_indices = @transform_0, window_bounds = array<i64: 1, 6, 128>}, {transform_indices = @transform_1, window_bounds = array<i64: 1, 4, 128>}, {pipeline_mode = #tpu.pipeline_mode<synchronous>, transform_indices = @transform_2, window_bounds = array<i64: 8, 6>}, {pipeline_mode = #tpu.pipeline_mode<synchronous>, transform_indices = @transform_3, window_bounds = array<i64: 8, 4>}, {pipeline_mode = #tpu.pipeline_mode<synchronous>, transform_indices = @transform_4, window_bounds = array<i64: 8, 1>}, {pipeline_mode = #tpu.pipeline_mode<synchronous>, transform_indices = @transform_5, window_bounds = array<i64: 8, 1>}, {pipeline_mode = #tpu.pipeline_mode<synchronous>, transform_indices = @transform_6, window_bounds = array<i64: 8, 1>}, {pipeline_mode = #tpu.pipeline_mode<synchronous>, transform_indices = @transform_7, window_bounds = array<i64: 8, 1>}, {transform_indices = @transform_8, window_bounds = array<i64: 1, 8, 128>}]} {
    %c0 = arith.constant 0 : index
    %c0_0 = arith.constant 0 : index
    %0 = vector.load %arg4[%c0, %c0_0] : memref<8x6xbf16, #tpu.memory_space<vmem>>, vector<8x6xbf16>
    %c0_1 = arith.constant 0 : index
    %c0_2 = arith.constant 0 : index
    %c0_3 = arith.constant 0 : index
    %1 = vector.load %arg2[%c0_1, %c0_2, %c0_3] : memref<1x6x128xbf16, #tpu.memory_space<vmem>>, vector<1x6x128xbf16>
    %2 = vector.shape_cast %1 : vector<1x6x128xbf16> to vector<6x128xbf16>
    %cst = arith.constant dense<0.000000e+00> : vector<8x128xf32>
    %3 = tpu.matmul %0, %2, %cst {dimension_numbers = #tpu.dot_dimension_numbers<[1], [0], [0], [1], [0, 0, 1, 1], [], []>} : vector<8x6xbf16>, vector<6x128xbf16>, vector<8x128xf32> -> vector<8x128xf32>
    %c0_4 = arith.constant 0 : index
    %c0_5 = arith.constant 0 : index
    %4 = vector.load %arg5[%c0_4, %c0_5] : memref<8x4xbf16, #tpu.memory_space<vmem>>, vector<8x4xbf16>
    %c0_6 = arith.constant 0 : index
    %c0_7 = arith.constant 0 : index
    %c0_8 = arith.constant 0 : index
    %5 = vector.load %arg3[%c0_6, %c0_7, %c0_8] : memref<1x4x128xf32, #tpu.memory_space<vmem>>, vector<1x4x128xf32>
    %6 = vector.shape_cast %5 : vector<1x4x128xf32> to vector<4x128xf32>
    %7 = arith.truncf %6 : vector<4x128xf32> to vector<4x128xbf16>
    %cst_9 = arith.constant dense<0.000000e+00> : vector<8x128xf32>
    %8 = tpu.matmul %4, %7, %cst_9 {dimension_numbers = #tpu.dot_dimension_numbers<[1], [0], [0], [1], [0, 0, 1, 1], [], []>} : vector<8x4xbf16>, vector<4x128xbf16>, vector<8x128xf32> -> vector<8x128xf32>
    %c0_10 = arith.constant 0 : index
    %c0_11 = arith.constant 0 : index
    %9 = vector.load %arg6[%c0_10, %c0_11] : memref<8x1xf32, #tpu.memory_space<vmem>>, vector<8x1xf32>
    %10 = vector.broadcast %9 : vector<8x1xf32> to vector<8x128xf32>
    %11 = arith.mulf %3, %10 : vector<8x128xf32>
    %c0_12 = arith.constant 0 : index
    %c0_13 = arith.constant 0 : index
    %12 = vector.load %arg7[%c0_12, %c0_13] : memref<8x1xf32, #tpu.memory_space<vmem>>, vector<8x1xf32>
    %13 = vector.broadcast %12 : vector<8x1xf32> to vector<8x128xf32>
    %14 = arith.addf %11, %13 : vector<8x128xf32>
    %c0_14 = arith.constant 0 : index
    %c0_15 = arith.constant 0 : index
    %15 = vector.load %arg8[%c0_14, %c0_15] : memref<8x1xf32, #tpu.memory_space<vmem>>, vector<8x1xf32>
    %16 = vector.broadcast %15 : vector<8x1xf32> to vector<8x128xf32>
    %17 = arith.mulf %8, %16 : vector<8x128xf32>
    %18 = arith.addf %14, %17 : vector<8x128xf32>
    %c0_16 = arith.constant 0 : index
    %c0_17 = arith.constant 0 : index
    %19 = vector.load %arg9[%c0_16, %c0_17] : memref<8x1xf32, #tpu.memory_space<vmem>>, vector<8x1xf32>
    %20 = vector.broadcast %19 : vector<8x1xf32> to vector<8x128xf32>
    %21 = arith.addf %18, %20 : vector<8x128xf32>
    %cst_18 = arith.constant 0.000000e+00 : f32
    %22 = vector.broadcast %cst_18 : f32 to vector<8x128xf32>
    %23 = arith.maximumf %21, %22 : vector<8x128xf32>
    %c0_19 = arith.constant 0 : index
    %c0_20 = arith.constant 0 : index
    %c0_21 = arith.constant 0 : index
    %24 = vector.load %arg10[%c0_19, %c0_20, %c0_21] : memref<1x8x128xf32, #tpu.memory_space<vmem>>, vector<1x8x128xf32>
    %25 = vector.shape_cast %24 : vector<1x8x128xf32> to vector<8x128xf32>
    %26 = vector.shape_cast %23 : vector<8x128xf32> to vector<1x8x128xf32>
    tpu.vector_store %arg10[%c0_19, %c0_20, %c0_21], %26 {strides = array<i32>} : memref<1x8x128xf32, #tpu.memory_space<vmem>>, vector<1x8x128xf32>,
    return
  }
  func.func @transform_0(%arg0: i32, %arg1: i32) -> (i32, i32, i32) {
    %c0_i32 = arith.constant 0 : i32
    %c0_i32_0 = arith.constant 0 : i32
    return %arg0, %c0_i32, %arg1 : i32, i32, i32
  }
  func.func @transform_1(%arg0: i32, %arg1: i32) -> (i32, i32, i32) {
    %c0_i32 = arith.constant 0 : i32
    %c0_i32_0 = arith.constant 0 : i32
    return %arg0, %c0_i32, %arg1 : i32, i32, i32
  }
  func.func @transform_2(%arg0: i32, %arg1: i32) -> (i32, i32) {
    %c0_i32 = arith.constant 0 : i32
    %c0_i32_0 = arith.constant 0 : i32
    %c0_i32_1 = arith.constant 0 : i32
    return %c0_i32, %c0_i32_0 : i32, i32
  }
  func.func @transform_3(%arg0: i32, %arg1: i32) -> (i32, i32) {
    %c0_i32 = arith.constant 0 : i32
    %c0_i32_0 = arith.constant 0 : i32
    %c0_i32_1 = arith.constant 0 : i32
    return %c0_i32, %c0_i32_0 : i32, i32
  }
  func.func @transform_4(%arg0: i32, %arg1: i32) -> (i32, i32) {
    %c0_i32 = arith.constant 0 : i32
    %c0_i32_0 = arith.constant 0 : i32
    %c0_i32_1 = arith.constant 0 : i32
    return %c0_i32, %c0_i32_0 : i32, i32
  }
  func.func @transform_5(%arg0: i32, %arg1: i32) -> (i32, i32) {
    %c0_i32 = arith.constant 0 : i32
    %c0_i32_0 = arith.constant 0 : i32
    %c0_i32_1 = arith.constant 0 : i32
    return %c0_i32, %c0_i32_0 : i32, i32
  }
  func.func @transform_6(%arg0: i32, %arg1: i32) -> (i32, i32) {
    %c0_i32 = arith.constant 0 : i32
    %c0_i32_0 = arith.constant 0 : i32
    %c0_i32_1 = arith.constant 0 : i32
    return %c0_i32, %c0_i32_0 : i32, i32
  }
  func.func @transform_7(%arg0: i32, %arg1: i32) -> (i32, i32) {
    %c0_i32 = arith.constant 0 : i32
    %c0_i32_0 = arith.constant 0 : i32
    %c0_i32_1 = arith.constant 0 : i32
    return %c0_i32, %c0_i32_0 : i32, i32
  }
  func.func @transform_8(%arg0: i32, %arg1: i32) -> (i32, i32, i32) {
    %c0_i32 = arith.constant 0 : i32
    %c0_i32_0 = arith.constant 0 : i32
    return %arg0, %c0_i32, %arg1 : i32, i32, i32
  }
}

</mosaic_0001>

<bundles_post_ra>
// kernel: unit_gcn_forward.5
= control target key start
LH: loop header
LB: loop body
LE: loop exit
PB: predicated region body
PF: predicated region fallthrough
CT: control target
= control target key end

     0   :  { %s711_s27 = smov 0   ;;  %s713_s28 = smov 0   ;;  %s769_s0 = inlined_call_operand.vmem [shape: bf16[2,6,128], index: 0, kind: input, shape index: {}]   ;;  %s770_s1 = inlined_call_operand.vmem [shape: f32[2,4,128], index: 1, kind: input, shape index: {}]   ;;  %s771_s2 = inlined_call_operand.vmem [shape: bf16[8,6], index: 2, kind: input, shape index: {}]   ;;  %s772_s3 = inlined_call_operand.vmem [shape: bf16[8,4], index: 3, kind: input, shape index: {}]   ;;  %s773_s4 = inlined_call_operand.vmem [shape: f32[8,1], index: 4, kind: input, shape index: {}]   ;;  %s774_s5 = inlined_call_operand.vmem [shape: f32[8,1], index: 5, kind: input, shape index: {}]   ;;  %s775_s6 = inlined_call_operand.vmem [shape: f32[8,1], index: 6, kind: input, shape index: {}]   ;;  %s776_s7 = inlined_call_operand.vmem [shape: f32[8,1], index: 7, kind: input, shape index: {}]   ;;  %s777_s8 = inlined_call_operand.vmem [shape: f32[2,8,128], index: 8, kind: output, shape index: {}]  }
   0x1   :  { %s715_s29 = smov 0  }
   0x2 LB: > { %s30_s30 = sadd.s32 1, %s657_s28  ;;  %p586_p0 = scmp.ge.s32.totalorder %s661_s29, 1  ;;  %s661_s29 = sphi %s715_s29, %s18_s29   ;;  %s657_s28 = sphi %s713_s28, %s779_s28   ;;  %s653_s27 = sphi %s711_s27, %s778_s27  }
   0x3   : > { %p32_p1 = scmp.ge.s32.totalorder %s30_s30, 2  ;;  %p294_p2 = scmp.lt.s32.totalorder %s661_s29, 3 }
   0x5   : > { %s781_s30 = smov (%p32_p1, %s30_s30), 0  ;;  %p295_p3 = pnand %p586_p0, %p294_p2 }
   0x6   : > { %p339_p4 = scmp.lt.s32.totalorder (!%p295_p3), %s653_s27, 1 }
   0x7   : > { %298 = sbr.rel (%p295_p3) target bundleno = 226 (0xe2), region = 52 }
   0xc   : > { %v663_v0 = vmov 0.0   ;;  %v462_v1 = vld [vmem:[%s773_s4] sm:$0xff]  ;;  %s783_s27 = smov (!%p339_p4, %s653_s27), 1  ;;  %vm664_vm0 = vmmov 0   ;;  %v665_v3 = vmov 0   ;;  %vm367_vm1 = vcmask 1042432  }
   0xd   : > { %598 = vmatprep.subr.bf16.mxu0 %v663_v0  ;;  %604 = vmatprep.subr.bf16.mxu1 %v663_v0  ;;  %v476_v2 = vld [vmem:[%s775_s6] sm:$0xff]  ;;  %s587_s13 = sshll.u32 %s783_s27, 2  ;;  %vm418_vm2 = vcmask 1041408   ;;  %vm363_vm3 = vcmask 48128   ;;  %vm414_vm4 = vcmask 31744   ;;  %s589_s10 = sshll.u32 %s783_s27, 3 }
   0xe   : > { %600 = vmatprep.mubr.msk.bf16.mxu0 %vm664_vm0, %v663_v0  ;;  %606 = vmatprep.mubr.msk.bf16.mxu1 %vm664_vm0, %v663_v0  ;;  %s345_s16 = scalar_lea.vmem %s769_s0, %s587_s13  ;;  %v469_v4 = vld [vmem:[%s774_s5] sm:$0xff]  ;;  %s352_s21 = scalar_lea.vmem %s770_s1, %s587_s13 }
   0xf   : > { %637 = vset.pattern.permute.xlu0 %v665_v3  ;;  %638 = vset.pattern.permute.xlu1 %v665_v3  ;;  %v362_v5 = vld [vmem:[%s345_s16] sm:$0x7]  ;;  %s359_s13 = scalar_lea.vmem %s777_s8, %s589_s10 }
  0x10   : > { %465 = vperm.xlu0 %637, %v462_v1   ;;  %479 = vperm.xlu1 %638, %v476_v2   ;;  %v484_v6 = vld [vmem:[%s776_s7] sm:$0xff]  ;;  %v369_v7 = vsel %vm367_vm1, %v362_v5, 0 }
  0x11   : > { %v412_v8 = vld [vmem:[%s352_s21] sm:$0xf]  ;;  %599 = vmatpush3.bf16.msra.mxu0 %v369_v7 }
  0x12   : > { %v413_v9 = vpack.c.bf16 %v412_v8, %v412_v8  ;;  %v361_v10 = vld [vmem:[%s771_s2] sm:$0xf] }
  0x13   : > { %v411_v12 = vld [vmem:[%s772_s3] sm:$0xf] }
  0x14   : > { %472 = vperm.xlu0 %637, %v469_v4   ;;  %487 = vperm.xlu1 %638, %v484_v6   ;;  %v420_v11 = vsel %vm418_vm2, %v413_v9, 0 }
  0x15   : > { %605 = vmatpush3.bf16.msra.mxu1 %v420_v11  ;;  %601 = vmatmul.mubr.msk.bf16.vlgmr.msra.gmra.mxu0 %vm363_vm3, %v361_v10 }
  0x18   : > { %607 = vmatmul.mubr.msk.bf16.vlgmr.msra.gmra.mxu1 %vm414_vm4, %v411_v12 }
  0x8b   : > { %v466_v13 = vpop.permute.xlu0 %465  ;;  %v480_v15 = vpop.permute.xlu1 %479 }
  0x8f   : > { %v473_v17 = vpop.permute.xlu0 %472  ;;  %v488_v26 = vpop.permute.xlu1 %487 }
  0xd5   : > { %v405_v14 = vpop.f32.mrf.mxu0 }
  0xd6   : > { %v468_v16 = vmul.f32 %v466_v13, %v405_v14 }
  0xd7   : > { %v602_v18 = vpop.f32.mrf.mxu0 }
  0xd8   : > { %v475_v19 = vadd.f32 %v473_v17, %v468_v16  ;;  %v456_v20 = vpop.f32.mrf.mxu1 }
  0xd9   : > { %v482_v21 = vmul.f32 %v480_v15, %v456_v20  ;;  %v408_v22 = vpop.f32.mrf.mxu0 }
  0xda   : > { %v608_v23 = vpop.f32.mrf.mxu1 }
  0xdb   : > { %v483_v24 = vadd.f32 %v482_v21, %v475_v19  ;;  %v603_v25 = vpop.f32.mrf.mxu0 }
  0xdc   : > { %v459_v27 = vpop.f32.mrf.mxu1 }
  0xdd   : > { %v490_v28 = vadd.f32 %v488_v26, %v483_v24 }
  0xde   : > { %v609_v29 = vpop.f32.mrf.mxu1 }
  0xdf   : > { %v491_v30 = vmax.f32 %v490_v28, 0.0 }
  0xe1   : > { %492 = vst [vmem:[%s359_s13] sm:$0xff] %v491_v30 }
  0xe2 PF: > { %s18_s29 = sadd.s32 1, %s661_s29   ;;  %s778_s27 = smov %s657_s28 }
  0xe3   : > { %p15_p5 = scmp.ge.s32.totalorder %s18_s29, 4   ;;  %s779_s28 = smov %s781_s30 }
  0xe5   :  { %17 = sbr.rel (!%p15_p5) target bundleno = 2 (0x2), region = 85 }

// kernel: unit_gcn_forward.3
= control target key start
LH: loop header
LB: loop body
LE: loop exit
PB: predicated region body
PF: predicated region fallthrough
CT: control target
= control target key end

     0   :  { %s772_s21 = smov 0   ;;  %s774_s22 = smov 0   ;;  %s900_s0 = inlined_call_operand.vmem [shape: f32[2,4,128], index: 0, kind: input, shape index: {}]   ;;  %s901_s1 = inlined_call_operand.vmem [shape: bf16[6,4], index: 1, kind: input, shape index: {}]   ;;  %s902_s2 = inlined_call_operand.vmem [shape: f32[6,1], index: 2, kind: input, shape index: {}]   ;;  %s903_s3 = inlined_call_operand.vmem [shape: f32[6,1], index: 3, kind: input, shape index: {}]   ;;  %s904_s4 = inlined_call_operand.vmem [shape: f32[128,16], index: 4, kind: input, shape index: {}]   ;;  %s905_s5 = inlined_call_operand.vmem [shape: bf16[2,6,128], index: 5, kind: output, shape index: {0}]   ;;  %s906_s6 = inlined_call_operand.vmem [shape: f32[2,4,16], index: 6, kind: output, shape index: {1}]  }
   0x1   :  { %s776_s23 = smov 0  }
   0x2 LB: > { %s29_s24 = sadd.s32 1, %s728_s22  ;;  %p615_p0 = scmp.ge.s32.totalorder %s732_s23, 1  ;;  %s732_s23 = sphi %s776_s23, %s17_s23   ;;  %s728_s22 = sphi %s774_s22, %s908_s22   ;;  %s724_s21 = sphi %s772_s21, %s907_s21  }
   0x3   : > { %p31_p1 = scmp.ge.s32.totalorder %s29_s24, 2  ;;  %p244_p2 = scmp.lt.s32.totalorder %s732_s23, 3 }
   0x5   : > { %s910_s24 = smov (%p31_p1, %s29_s24), 0  ;;  %p245_p3 = pnand %p615_p0, %p244_p2 }
   0x6   : > { %p287_p4 = scmp.lt.s32.totalorder (!%p245_p3), %s724_s21, 1 }
   0x7   : > { %248 = sbr.rel (%p245_p3) target bundleno = 251 (0xfb), region = 40 }
   0xc   : > { %v402_v0 = vld [vmem:[%s904_s4 + $0x78] sm:$0xff]  ;;  %v734_v1 = vmov 0.0   ;;  %v401_v2 = vld [vmem:[%s904_s4 + $0x70] sm:$0xff]  ;;  %s912_s21 = smov (!%p287_p4, %s724_s21), 1  ;;  %vm735_vm0 = vmmov 0   ;;  %v400_v3 = vld [vmem:[%s904_s4 + $0x68] sm:$0xff] }
   0xd   : > { %647 = vmatprep.subr.mxu1 %v734_v1  ;;  %641 = vmatprep.subr.bf16.mxu0 %v734_v1  ;;  %vm477_vm1 = vcmask 125952   ;;  %s804_s7 = sshll.u32 %s912_s21, 2  ;;  %v736_v4 = vmov 0   ;;  %v399_v5 = vld [vmem:[%s904_s4 + $0x60] sm:$0xff]  ;;  %vm319_vm2 = vcmask 1041408   ;;  %v398_v8 = vld [vmem:[%s904_s4 + $0x58] sm:$0xff] }
   0xe   : > { %648 = vmatpush3.msra.mxu1 %v402_v0  ;;  %643 = vmatprep.mubr.msk.bf16.mxu0 %vm735_vm0, %v734_v1  ;;  %s293_s12 = scalar_lea.vmem %s900_s0, %s804_s7  ;;  %s818_s15 = scalar_lea.vmem %s906_s6, %s804_s7  ;;  %v363_v6 = vld [vmem:[%s902_s2] sm:$0x3f]  ;;  %v397_v11 = vld [vmem:[%s904_s4 + $0x50] sm:$0xff]  ;;  %vm315_vm3 = vcmask 31744   ;;  %v396_v14 = vld [vmem:[%s904_s4 + $0x48] sm:$0xff] }
   0xf   : > { %649 = vmatprep.subr.mxu1 %v734_v1  ;;  %679 = vmatprep.mubr.msk.f32.mxu1 %vm735_vm0, %v734_v1  ;;  %v312_v7 = vld [vmem:[%s293_s12] sm:$0xf]  ;;  %478 = vst.msk [vmem:[%s818_s15] sm:$0xf] %vm477_vm1, %v734_v1  ;;  %v394_v16 = vld [vmem:[%s904_s4 + $0x38] sm:$0xff]  ;;  %v393_v17 = vld [vmem:[%s904_s4 + $0x30] sm:$0xff]  ;;  %s306_s9 = scalar_lea.vmem %s905_s5, %s804_s7 }
  0x10   : > { %650 = vmatpush3.msra.mxu1 %v401_v2  ;;  %709 = vset.pattern.permute.xlu0 %v736_v4  ;;  %v314_v9 = vpack.c.bf16 %v312_v7, %v312_v7  ;;  %v370_v10 = vld [vmem:[%s903_s3] sm:$0x3f]  ;;  %v392_v18 = vld [vmem:[%s904_s4 + $0x28] sm:$0xff]  ;;  %v390_v20 = vld [vmem:[%s904_s4 + $0x18] sm:$0xff] }
  0x11   : > { %651 = vmatprep.subr.mxu1 %v734_v1  ;;  %366 = vperm.xlu0 %709, %v363_v6   ;;  %v313_v13 = vld [vmem:[%s901_s1] sm:$0x7]  ;;  %v389_v21 = vld [vmem:[%s904_s4 + $0x10] sm:$0xff]  ;;  %v388_v22 = vld [vmem:[%s904_s4 + $0x8] sm:$0xff] }
  0x12   : > { %652 = vmatpush3.msra.mxu1 %v400_v3  ;;  %v321_v12 = vsel %vm319_vm2, %v314_v9, 0  ;;  %v395_v15 = vld [vmem:[%s904_s4 + $0x40] sm:$0xff] }
  0x13   : > { %653 = vmatprep.subr.mxu1 %v734_v1  ;;  %642 = vmatpush3.bf16.msra.mxu0 %v321_v12  ;;  %v391_v19 = vld [vmem:[%s904_s4 + $0x20] sm:$0xff] }
  0x14   : > { %654 = vmatpush3.msra.mxu1 %v399_v5  ;;  %v387_v23 = vld [vmem:[%s904_s4] sm:$0xff] }
  0x15   : > { %655 = vmatprep.subr.mxu1 %v734_v1  ;;  %373 = vperm.xlu0 %709, %v370_v10  }
  0x16   : > { %656 = vmatpush3.msra.mxu1 %v398_v8  ;;  %644 = vmatmul.mubr.msk.bf16.vlgmr.msra.gmra.mxu0 %vm315_vm3, %v313_v13  ;;  %v479_v34 = vld [vmem:[%s818_s15] sm:$0xf] }
  0x17   : > { %657 = vmatprep.subr.mxu1 %v734_v1 }
  0x18   : > { %658 = vmatpush3.msra.mxu1 %v397_v11 }
  0x19   : > { %659 = vmatprep.subr.mxu1 %v734_v1 }
  0x1a   : > { %660 = vmatpush3.msra.mxu1 %v396_v14 }
  0x1b   : > { %661 = vmatprep.subr.mxu1 %v734_v1 }
  0x1c   : > { %662 = vmatpush3.msra.mxu1 %v395_v15 }
  0x1d   : > { %663 = vmatprep.subr.mxu1 %v734_v1 }
  0x1e   : > { %664 = vmatpush3.msra.mxu1 %v394_v16 }
  0x1f   : > { %665 = vmatprep.subr.mxu1 %v734_v1 }
  0x20   : > { %666 = vmatpush3.msra.mxu1 %v393_v17 }
  0x21   : > { %667 = vmatprep.subr.mxu1 %v734_v1 }
  0x22   : > { %668 = vmatpush3.msra.mxu1 %v392_v18 }
  0x23   : > { %669 = vmatprep.subr.mxu1 %v734_v1 }
  0x24   : > { %670 = vmatpush3.msra.mxu1 %v391_v19 }
  0x25   : > { %671 = vmatprep.subr.mxu1 %v734_v1 }
  0x26   : > { %672 = vmatpush3.msra.mxu1 %v390_v20 }
  0x27   : > { %673 = vmatprep.subr.mxu1 %v734_v1 }
  0x28   : > { %674 = vmatpush3.msra.mxu1 %v389_v21 }
  0x29   : > { %675 = vmatprep.subr.mxu1 %v734_v1 }
  0x2a   : > { %676 = vmatpush3.msra.mxu1 %v388_v22 }
  0x2b   : > { %677 = vmatprep.subr.mxu1 %v734_v1 }
  0x2c   : > { %678 = vmatpush3.msra.mxu1 %v387_v23 }
  0x2d   : > { %680 = vmatmul.mubr.f32.vlgmr.msra.gmra.mxu1 %v312_v7 }
  0x8c   : > { %v367_v24 = vpop.permute.xlu0 %366 }
  0x90   : > { %v374_v26 = vpop.permute.xlu0 %373 }
  0xd6   : > { %v357_v25 = vpop.f32.mrf.mxu0 }
  0xd7   : > { %v369_v27 = vmul.f32 %v367_v24, %v357_v25 }
  0xd8   : > { %v645_v28 = vpop.f32.mrf.mxu0 }
  0xd9   : > { %v376_v29 = vadd.f32 %v374_v26, %v369_v27 }
  0xda   : > { %v360_v30 = vpop.f32.mrf.mxu0 }
  0xdb   : > { %v377_v31 = vmax.f32 %v376_v29, 0.0 }
  0xdc   : > { %v646_v32 = vpop.f32.mrf.mxu0 }
  0xdd   : > { %v378_v33 = vpack.c.bf16 %v377_v31, %v377_v31 }
  0xdf   : > { %379 = vst [vmem:[%s306_s9] sm:$0x7] %v378_v33 }
  0xed   : > { %v469_v35 = vpop.f32.mrf.mxu1 }
  0xee   : > { %v480_v36 = vadd.f32 %v479_v34, %v469_v35 }
  0xef   : > { %v681_v37 = vpop.f32.mrf.mxu1 }
  0xf0   : > { %482 = vst.msk [vmem:[%s818_s15] sm:$0xf] %vm477_vm1, %v480_v36 }
  0xf7   : > { %v486_v38 = vld [vmem:[%s818_s15] sm:$0xf] }
  0xf8   : > { %v487_v39 = vmul.f32 0.125, %v486_v38 }
  0xfa   : > { %488 = vst.msk [vmem:[%s818_s15] sm:$0xf] %vm477_vm1, %v487_v39 }
  0xfb PF: > { %s17_s23 = sadd.s32 1, %s732_s23   ;;  %s907_s21 = smov %s728_s22 }
  0xfc   : > { %p14_p5 = scmp.ge.s32.totalorder %s17_s23, 4   ;;  %s908_s22 = smov %s910_s24 }
  0xfe   :  { %16 = sbr.rel (!%p14_p5) target bundleno = 2 (0x2), region = 93 }

// kernel: unit_gcn_forward.4
= control target key start
LH: loop header
LB: loop body
LE: loop exit
PB: predicated region body
PF: predicated region fallthrough
CT: control target
= control target key end

     0   :  { %s2556_s0 = inlined_call_operand.<no memory space> [shape: f32[1], index: 0, kind: input, shape index: {}]   ;;  %s2557_s1 = inlined_call_operand.<no memory space> [shape: f32[1], index: 1, kind: input, shape index: {}]   ;;  %s2558_s2 = inlined_call_operand.vmem [shape: f32[2,4,16], index: 2, kind: input, shape index: {}]   ;;  %s2559_s3 = inlined_call_operand.vmem [shape: f32[6,4], index: 3, kind: input, shape index: {}]   ;;  %s2560_s4 = inlined_call_operand.vmem [shape: f32[6,4], index: 4, kind: input, shape index: {}]   ;;  %s2561_s5 = inlined_call_operand.vmem [shape: f32[6,1], index: 5, kind: input, shape index: {}]   ;;  %s2562_s6 = inlined_call_operand.vmem [shape: f32[6,1], index: 6, kind: input, shape index: {}]   ;;  %s2563_s7 = inlined_call_operand.vmem [shape: f32[3,16,16], index: 7, kind: input, shape index: {}]   ;;  %s2564_s8 = inlined_call_operand.vmem [shape: bf16[2,6,8,16], index: 8, kind: input, shape index: {}]   ;;  %s2565_s9 = inlined_call_operand.vmem [shape: bf16[2,6,8,16], index: 9, kind: output, shape index: {0}]   ;;  %s2566_s10 = inlined_call_operand.hbm [shape: f32[2,6,16,16], index: 10, kind: output, shape index: {1}]   ;;  %s2567_s11 = inlined_call_operand.hbm [shape: f32[2,6,16,16], index: 11, kind: output, shape index: {2}]  }
   0x1   :  { %2570 = sst [smem:[#allocation10_spill]] %s2558_s2 }
   0x2   :  { %2571 = sst [smem:[#allocation11_spill]] %s2559_s3 }
   0x3   :  { %2572 = sst [smem:[#allocation12_spill]] %s2560_s4 }
   0x4   :  { %2573 = sst [smem:[#allocation13_spill]] %s2561_s5 }
   0x5   :  { %17 = sst [smem:[#allocation2]] %s2556_s0 }
   0x6   :  { %18 = sst [smem:[#allocation3]] %s2557_s1 }
   0x7   :  { %19 = vsyncpa [#allocation5], 0 }
   0x8   :  { %21 = vsyncpa [#allocation5 + $0x1], 0 }
   0x9   :  { %22 = vsyncpa [#allocation7], 0 }
   0xa   :  { %24 = vsyncpa [#allocation7 + $0x1], 0  ;;  %s2140_s21 = smov 0   ;;  %s2142_s22 = smov 0  }
   0xb   :  { %s2144_s23 = smov 0   ;;  %s2146_s24 = smov 0  }
   0xc LB: > { %s2161_s0 = sadd.s32 4294967295, %s2063_s24   ;;  %s1759_s1 = sadd.s32 4294967294, %s2063_s24   ;;  %s2063_s24 = sphi %s2146_s24, %s2586_s24   ;;  %s2059_s23 = sphi %s2144_s23, %s2585_s23   ;;  %s2055_s22 = sphi %s2142_s22, %s2584_s22   ;;  %s2051_s21 = sphi %s2140_s21, %s2583_s21  }
   0xd   : > { %s2165_s25 = sadd.s32 1, %s2063_s24   ;;  %s262_s26 = sadd.s32 1, %s2059_s23 }
   0xe   : > { %s259_s27 = ssub.s32 %s2063_s24, %s2165_s25  ;;  %p272_p0 = scmp.ne.s32.totalorder %s2059_s23, %s2055_s22 }
   0xf   : > { %p260_p1 = scmp.eq.s32.totalorder %s259_s27, 0  ;;  %p273_p2 = scmp.eq.s32.totalorder %s2161_s0, 1 }
  0x10   : > { %p278_p3 = scmp.ne.s32.totalorder %s2055_s22, %s2051_s21  ;;  %p279_p4 = scmp.eq.s32.totalorder %s1759_s1, 1 }
  0x11   : > { %s2176_s28 = scalar_select %p260_p1, %s2059_s23, %s262_s26  }
  0x12   : > { %p2178_p5 = por %p273_p2, %p272_p0  ;;  %p2182_p6 = por %p279_p4, %p278_p3 }
  0x13   : > { %p1762_p7 = scmp.ge.s32.totalorder %s2063_s24, 1  ;;  %p359_p8 = scmp.lt.s32.totalorder %s2063_s24, 3 }
  0x15   : > { %p360_p9 = pnand %p1762_p7, %p359_p8 }
  0x16   : > { %p413_p10 = scmp.lt.s32.totalorder (!%p360_p9), %s2161_s0, 1  ;;  %s2576_s5 = sld [smem:[#allocation13_spill]] (!%p360_p9) }
  0x17   : > { %363 = sbr.rel (%p360_p9) target bundleno = 847 (0x34f), region = 56  ;;  %s2577_s2 = sld [smem:[#allocation10_spill]] (!%p360_p9) }
  0x18   : > { %s2578_s3 = sld [smem:[#allocation11_spill]] (!%p360_p9)  ;;  %s2312_s16 = sand.u32 (!%p360_p9), 1, %s2055_s22  }
  0x19   : > { %s2579_s4 = sld [smem:[#allocation12_spill]] (!%p360_p9)  ;;  %s1875_s17 = smul.u32 (!%p360_p9), 96, %s2312_s16 }
  0x1a   : > { %s428_s13 = sld [smem:[#allocation2]] (!%p360_p9)  ;;  %s2569_s1 = smul.u32 (!%p360_p9), 1536, %s2161_s0 }
  0x1b   : > { %s2343_s27 = scalar_lea.vmem (!%p360_p9), [#allocation4], %s1875_s17  ;;  %s2366_s19 = scalar_lea.vmem (!%p360_p9), [#allocation6], %s1875_s17 }
  0x1c   : > { %v2065_v0 = vmov 0.0   ;;  %v432_v1 = vld [vmem:[%s2576_s5] sm:$0x3f]  ;;  %s2195_s14 = scalar_select %p413_p10, %s2161_s0, 1  ;;  %vm2066_vm0 = vmmov 0   ;;  %v2067_v2 = vmov 0   ;;  %v596_v7 = vlaneseq }
  0x1d   : > { %1814 = vmatprep.subr.mxu0 %v2065_v0  ;;  %1819 = vmatprep.subr.mxu1 %v2065_v0  ;;  %vm442_vm1 = vcmask 1043456   ;;  %vm438_vm2 = vcmask 31744   ;;  %v517_v6 = vld [vmem:[%s2562_s6] sm:$0x3f]  ;;  %v2068_v8 = vmov 1966171168   ;;  %s2458_s17 = scalar_lea.hbm %s2566_s10, %s2569_s1 }
  0x1e   : > { %1816 = vmatprep.mubr.msk.f32.mxu0 %vm2066_vm0, %v2065_v0  ;;  %1821 = vmatprep.mubr.msk.f32.mxu1 %vm2066_vm0, %v2065_v0  ;;  %s1763_s15 = sshll.u32 %s2195_s14, 2  ;;  %v431_v3 = vld [vmem:[%s2578_s3] sm:$0x3f]  ;;  %v665_v9 = vunpack.c.l.s4 %v2068_v8  ;;  %v2069_v10 = vmov 1983009808   ;;  %v2214_v13 = vshrl.u32 %v596_v7, 7 }
  0x1f   : > { %1930 = vset.pattern.permute.xlu0 %v2067_v2  ;;  %s416_s18 = scalar_lea.vmem %s2577_s2, %s1763_s15  ;;  %v516_v4 = vld [vmem:[%s2579_s4] sm:$0x3f]  ;;  %v780_v11 = vunpack.c.l.s4 %v2069_v10  ;;  %vm915_vm3 = vcmask 1041408   ;;  %vm908_vm4 = vcmask 15360   ;;  %vm1159_vm5 = vcmask 130048   ;;  %s429_s15 = sld [smem:[#allocation3]] }
  0x20   : > { %435 = vperm.xlu0 %1930, %v432_v1   ;;  %v430_v5 = vld [vmem:[%s416_s18] sm:$0xf]  ;;  %v666_v14 = vunpack.c.0.s8 %v665_v9  ;;  %v642_v24 = vsub.s32 4, %v2214_v13  ;;  %v653_v25 = vsub.s32 5, %v2214_v13  ;;  %v598_v37 = vsub.s32 0, %v2214_v13  ;;  %s2568_s18 = smul.u32 24, %s2195_s14 }
  0x21   : > { %1815 = vmatpush3.msk.msra.mxu0 %vm442_vm1, %v430_v5  ;;  %1820 = vmatpush3.msk.msra.mxu1 %vm442_vm1, %v430_v5  ;;  %v781_v15 = vunpack.c.0.s8 %v780_v11  ;;  %v609_v55 = vsub.s32 1, %v2214_v13  ;;  %v620_v57 = vsub.s32 2, %v2214_v13  ;;  %v631_v59 = vsub.s32 3, %v2214_v13  ;;  %s1612_s26 = sshll.u32 %s2343_s27, 4  ;;  %s2451_s26 = int_to_ptr.vmem [resolvable:$true] %s1612_s26 }
  0x22   : > { %1817 = vmatmul.mubr.msk.f32.vlgmr.msra.gmra.mxu0 %vm438_vm2, %v431_v3  ;;  %1822 = vmatmul.mubr.msk.f32.vlgmr.msra.gmra.mxu1 %vm438_vm2, %v516_v4  ;;  %v669_v17 = vsub.s32 %v666_v14, %v2214_v13 }
  0x23   : > { %v784_v18 = vsub.s32 %v781_v15, %v2214_v13 }
  0x24   : > { %520 = vperm.xlu0 %1930, %v517_v6  }
  0x9b   : > { %v436_v12 = vpop.permute.xlu0 %435 }
  0x9f   : > { %v521_v16 = vpop.permute.xlu0 %520 }
  0xe2   : > { %v512_v19 = vpop.f32.mrf.mxu0  ;;  %v592_v20 = vpop.f32.mrf.mxu1 }
  0xe3   : > { %v513_v21 = vadd.f32 %v512_v19, %v436_v12  ;;  %v593_v22 = vadd.f32 %v592_v20, %v521_v16 }
  0xe4   : > { %v1818_v23 = vpop.f32.mrf.mxu0  ;;  %v1823_v26 = vpop.f32.mrf.mxu1 }
  0xe5   : > { %v663_v27 = vcombine.high %v593_v22, %v593_v22  ;;  %v670_v28 = vrot.slane %v593_v22, %v669_v17  ;;  %v803_v29 = vrot.slane %v593_v22, %v784_v18  ;;  %v785_v30 = vrot.slane %v513_v21, %v784_v18 }
  0xe6   : > { %v778_v31 = vcombine.high %v513_v21, %v513_v21  ;;  %v643_v35 = vrot.slane %v513_v21, %v642_v24  ;;  %v654_v36 = vrot.slane %v513_v21, %v653_v25  ;;  %v599_v54 = vrot.slane %v513_v21, %v598_v37 }
  0xe7   : > { %v810_v32 = vrot.slane %v663_v27, %v784_v18  ;;  %1824 = vmatprep.subr.msk.mxu0 %vm915_vm3, %v803_v29  ;;  %812 = vxpose.xlu1.b32.start.end [1/1] (short) (narrow) %v785_v30, 16  ;;  %v811_v33 = vcombine.high %v803_v29, %v803_v29  ;;  %v686_v38 = vrot.slane %v670_v28, %v669_v17 }
  0xe8   : > { %1825 = vmatpush3.msk.msra.mxu0 %vm915_vm3, %v803_v29  ;;  %v792_v34 = vrot.slane %v778_v31, %v784_v18  ;;  %v678_v39 = vcombine.high %v670_v28, %v670_v28  ;;  %v677_v40 = vrot.slane %v663_v27, %v669_v17  ;;  %v793_v41 = vcombine.high %v785_v30, %v785_v30 }
  0xe9   : > { %1829 = vmatprep.subr.msk.mxu1 %vm915_vm3, %v811_v33  ;;  %1834 = vmatprep.subr.msk.mxu0 %vm915_vm3, %v810_v32  ;;  %v2226_v42 = vrot.slane %v686_v38, %v598_v37  ;;  %v708_v44 = vcombine.high %v686_v38, %v686_v38  ;;  %v610_v56 = vrot.slane %v513_v21, %v609_v55 }
  0xea   : > { %876 = vxpose.xlu0.b32.start.end [1/1] (short) (narrow) %v792_v34, 16  ;;  %1830 = vmatpush3.msk.msra.mxu1 %vm915_vm3, %v811_v33  ;;  %v700_v43 = vrot.slane %v678_v39, %v669_v17  ;;  %v693_v45 = vrot.slane %v677_v40, %v669_v17  ;;  %v679_v46 = vcombine.high %v677_v40, %v677_v40 }
  0xeb   : > { %1839 = vmatprep.subr.bf16.mxu1 %v2065_v0  ;;  %v2231_v48 = vrot.slane %v708_v44, %v598_v37  ;;  %v621_v58 = vrot.slane %v513_v21, %v620_v57  ;;  %v632_v60 = vrot.slane %v513_v21, %v631_v59 }
  0xec   : > { %844 = vxpose.xlu1.b32.start.end [1/1] (short) (narrow) %v793_v41, 16  ;;  %v2229_v47 = vrot.slane %v700_v43, %v598_v37  ;;  %v709_v49 = vcombine.high %v700_v43, %v700_v43  ;;  %v2233_v50 = vrot.slane %v693_v45, %v598_v37  ;;  %v707_v51 = vrot.slane %v679_v46, %v669_v17 }
  0xee   : > { %v2235_v52 = vrot.slane %v709_v49, %v598_v37  ;;  %v2237_v53 = vrot.slane %v707_v51, %v598_v37 }
 0x10e   : > { %601 = vbcast.lane.b32.xlu1 %v599_v54, 256 }
 0x112   : > { %612 = vbcast.lane.b32.xlu1 %v610_v56, 256 }
 0x116   : > { %616 = vbcast.lane.b32.xlu1 %v610_v56, 264 }
 0x117   : > { %605 = vbcast.lane.b32.xlu0 %v599_v54, 264 }
 0x11a   : > { %623 = vbcast.lane.b32.xlu1 %v621_v58, 256 }
 0x11e   : > { %627 = vbcast.lane.b32.xlu1 %v621_v58, 264 }
 0x122   : > { %634 = vbcast.lane.b32.xlu1 %v632_v60, 256 }
 0x126   : > { %638 = vbcast.lane.b32.xlu1 %v632_v60, 264 }
 0x12a   : > { %645 = vbcast.lane.b32.xlu1 %v643_v35, 256 }
 0x12e   : > { %649 = vbcast.lane.b32.xlu1 %v643_v35, 264 }
 0x132   : > { %656 = vbcast.lane.b32.xlu1 %v654_v36, 256 }
 0x136   : > { %660 = vbcast.lane.b32.xlu1 %v654_v36, 264 }
 0x163   : > { %v828_v61 = vpop.trf.xlu1 }
 0x164   : > { %1826 = vmatprep.mubr.msk.f32.mxu0 %vm908_vm4, %v828_v61 }
 0x166   : > { %v892_v62 = vpop.trf.xlu0 }
 0x167   : > { %v829_v63 = vpop.trf.xlu1 }
 0x168   : > { %1827 = vmatmul.mubr.msk.f32.vlgmr.msra.gmra.mxu0 %vm908_vm4, %v829_v63 }
 0x169   : > { %1835 = vmatpush3.msk.msra.mxu0 %vm915_vm3, %v810_v32  ;;  %1836 = vmatprep.mubr.msk.f32.mxu0 %vm908_vm4, %v892_v62 }
 0x16a   : > { %v893_v1 = vpop.trf.xlu0  ;;  %1845 = vmatprep.subr.bf16.mxu0 %v2065_v0 }
 0x16b   : > { %v860_v2 = vpop.trf.xlu1 }
 0x16c   : > { %1831 = vmatprep.mubr.msk.f32.mxu1 %vm908_vm4, %v860_v2  ;;  %1837 = vmatmul.mubr.msk.f32.vlgmr.msra.gmra.mxu0 %vm908_vm4, %v893_v1 }
 0x16d   : > { %1847 = vmatprep.mubr.msk.bf16.mxu0 %vm2066_vm0, %v2065_v0 }
 0x16f   : > { %v861_v3 = vpop.trf.xlu1 }
 0x170   : > { %1832 = vmatmul.mubr.msk.f32.vlgmr.msra.gmra.mxu1 %vm908_vm4, %v861_v3 }
 0x171   : > { %1841 = vmatprep.mubr.msk.bf16.mxu1 %vm2066_vm0, %v2065_v0 }
 0x180   : > { %v2248_v4 = vpop.permute.xlu1 %601 }
 0x184   : > { %v2250_v5 = vpop.permute.xlu1 %612 }
 0x188   : > { %v2252_v7 = vpop.permute.xlu1 %616 }
 0x18c   : > { %v2258_v17 = vpop.permute.xlu1 %623 }
 0x190   : > { %v2262_v29 = vpop.permute.xlu1 %627 }
 0x194   : > { %v2264_v40 = vpop.permute.xlu1 %634 }
 0x198   : > { %v2266_v57 = vpop.permute.xlu1 %638 }
 0x19c   : > { %v646_v62 = vpop.permute.xlu1 %645 }
 0x228   : > { %v1828_v6 = vpop.f32.mrf.mxu0 }
 0x229   : > { %v1161_v9 = vsel %vm1159_vm5, %v1828_v6, -inf }
 0x22a   : > { %v984_v8 = vpop.f32.mrf.mxu0 }
 0x22b   : > { %v1160_v10 = vsel %vm1159_vm5, %v984_v8, -inf }
 0x22c   : > { %v1162_v11 = vmax.f32 %v1160_v10, %v1161_v9  ;;  %v1838_v12 = vpop.f32.mrf.mxu0  ;;  %v740_v10 = vsub.f32 %v2248_v4, %v2226_v42 }
 0x22d   : > { %v1179_v13 = vsel %vm1159_vm5, %v1838_v12, -inf }
 0x22e   : > { %v1163_v14 = vrot.slane %v1162_v11, 4  ;;  %v1150_v15 = vpop.f32.mrf.mxu0 }
 0x22f   : > { %v1178_v16 = vsel %vm1159_vm5, %v1150_v15, -inf }
 0x230   : > { %v1164_v18 = vmax.f32 %v1162_v11, %v1163_v14  ;;  %v1180_v19 = vmax.f32 %v1178_v16, %v1179_v13  ;;  %v1833_v20 = vpop.f32.mrf.mxu1 }
 0x231   : > { %v1170_v24 = vsel %vm1159_vm5, %v1833_v20, -inf }
 0x232   : > { %v1165_v21 = vrot.slane %v1164_v18, 2  ;;  %v1181_v22 = vrot.slane %v1180_v19, 4  ;;  %v1067_v23 = vpop.f32.mrf.mxu1 }
 0x233   : > { %v1169_v25 = vsel %vm1159_vm5, %v1067_v23, -inf }
 0x234   : > { %v1166_v26 = vmax.f32 %v1164_v18, %v1165_v21  ;;  %v1182_v27 = vmax.f32 %v1180_v19, %v1181_v22  ;;  %v1171_v28 = vmax.f32 %v1169_v25, %v1170_v24  ;;  %v743_v18 = vsub.f32 %v2252_v7, %v2229_v47 }
 0x236   : > { %v1167_v30 = vrot.slane %v1166_v26, 1  ;;  %v1183_v31 = vrot.slane %v1182_v27, 2  ;;  %v1172_v32 = vrot.slane %v1171_v28, 4 }
 0x238   : > { %v1168_v33 = vmax.f32 %v1166_v26, %v1167_v30  ;;  %v1184_v34 = vmax.f32 %v1182_v27, %v1183_v31  ;;  %v1173_v35 = vmax.f32 %v1171_v28, %v1172_v32 }
 0x23a   : > { %v1187_v36 = vsub.f32 %v984_v8, %v1168_v33  ;;  %v1188_v37 = vsub.f32 %v1828_v6, %v1168_v33  ;;  %v1185_v38 = vrot.slane %v1184_v34, 1  ;;  %v1174_v39 = vrot.slane %v1173_v35, 2  ;;  %v650_v6 = vpop.permute.xlu1 %649 }
 0x23b   : > { %v748_v33 = vsub.f32 %v646_v62, %v2233_v50 }
 0x23c   : > { %v1193_v41 = vmul.f32 1.442695, %v1187_v36  ;;  %v1195_v43 = vmul.f32 1.442695, %v1188_v37  ;;  %v1186_v44 = vmax.f32 %v1184_v34, %v1185_v38  ;;  %v1175_v45 = vmax.f32 %v1173_v35, %v1174_v39 }
 0x23e   : > { %1931 = vpow2.f32 %v1193_v41  ;;  %v1191_v46 = vsub.f32 %v1150_v15, %v1186_v44  ;;  %v1192_v49 = vsub.f32 %v1838_v12, %v1186_v44  ;;  %v1176_v51 = vrot.slane %v1175_v45, 1  ;;  %v606_v12 = vpop.permute.xlu0 %605  ;;  %v657_v24 = vpop.permute.xlu1 %656 }
 0x23f   : > { %1933 = vpow2.f32 %v1195_v43  ;;  %v742_v15 = vsub.f32 %v2250_v5, %v2229_v47  ;;  %v741_v4 = vsub.f32 %v606_v12, %v2226_v42  ;;  %v745_v47 = vsub.f32 %v2262_v29, %v2231_v48 }
 0x240   : > { %v1201_v54 = vmul.f32 1.442695, %v1191_v46  ;;  %v1203_v55 = vmul.f32 1.442695, %v1192_v49  ;;  %v1177_v56 = vmax.f32 %v1175_v45, %v1176_v51  ;;  %v750_v37 = vsub.f32 %v657_v24, %v2237_v53 }
 0x241   : > { %v747_v44 = vsub.f32 %v2266_v57, %v2235_v52 }
 0x242   : > { %1935 = vpow2.f32 %v1201_v54  ;;  %v1189_v58 = vsub.f32 %v1067_v23, %v1177_v56  ;;  %v1190_v59 = vsub.f32 %v1833_v20, %v1177_v56  ;;  %v744_v23 = vsub.f32 %v2258_v17, %v2231_v48  ;;  %v661_v29 = vpop.permute.xlu1 %660 }
 0x243   : > { %1937 = vpow2.f32 %v1203_v55  ;;  %v746_v17 = vsub.f32 %v2264_v40, %v2235_v52  ;;  %v749_v48 = vsub.f32 %v650_v6, %v2233_v50  ;;  %v751_v40 = vsub.f32 %v661_v29, %v2237_v53 }
 0x244   : > { %v1197_v60 = vmul.f32 1.442695, %v1189_v58  ;;  %v1199_v61 = vmul.f32 1.442695, %v1190_v59  ;;  %v2314_v56 = vstv %s428_s13  ;;  %v2317_v58 = vstv %s429_s15  ;;  %s2358_s15 = scalar_lea.vmem %s2564_s8, %s2568_s18  ;;  %s1973_s18 = scalar_lea.vmem %s2451_s26, 1536 }
 0x245   : > { %p1974_p11 = scmp.ne.s32.totalorder %s2451_s26, %s1973_s18 }
 0x246   : > { %1939 = vpow2.f32 %v1197_v60 }
 0x247   : > { %1941 = vpow2.f32 %v1199_v61  ;;  %p1975_p12 = pnand %p1974_p11, %p2178_p5 }
 0x248   : > { %1943 = vtanh.f32 %v740_v10 }
 0x249   : > { %1945 = vtanh.f32 %v742_v15  ;;  %p1976_p13 = pneg %p1975_p12 }
 0x24a   : > { %1947 = vtanh.f32 %v743_v18 }
 0x24b   : > { %v2268_v63 = vpop.eup %1931  ;;  %1949 = vtanh.f32 %v741_v4 }
 0x24c   : > { %v2270_v1 = vpop.eup %1933  ;;  %v1205_v2 = vsel %vm1159_vm5, %v2268_v63, 0.0  ;;  %1951 = vtanh.f32 %v744_v23 }
 0x24d   : > { %v1206_v3 = vsel %vm1159_vm5, %v2270_v1, 0.0  ;;  %1953 = vtanh.f32 %v745_v47 }
 0x24e   : > { %v1207_v8 = vadd.f32 %v1206_v3, %v1205_v2  ;;  %1955 = vtanh.f32 %v746_v17 }
 0x24f   : > { %v2276_v9 = vpop.eup %1935 }
 0x250   : > { %v2280_v11 = vpop.eup %1937  ;;  %v1208_v13 = vrot.slane %v1207_v8, 4  ;;  %v1223_v14 = vsel %vm1159_vm5, %v2276_v9, 0.0 }
 0x251   : > { %v1224_v16 = vsel %vm1159_vm5, %v2280_v11, 0.0 }
 0x252   : > { %v1209_v19 = vadd.f32 %v1208_v13, %v1207_v8  ;;  %v1225_v20 = vadd.f32 %v1224_v16, %v1223_v14 }
 0x253   : > { %v2290_v21 = vpop.eup %1939 }
 0x254   : > { %v2293_v22 = vpop.eup %1941  ;;  %v1210_v5 = vrot.slane %v1209_v19, 2  ;;  %v1226_v25 = vrot.slane %v1225_v20, 4  ;;  %v1214_v26 = vsel %vm1159_vm5, %v2290_v21, 0.0 }
 0x255   : > { %v1215_v7 = vsel %vm1159_vm5, %v2293_v22, 0.0  ;;  %v1944_v50 = vpop.eup %1943 }
 0x256   : > { %v1211_v42 = vadd.f32 %v1210_v5, %v1209_v19  ;;  %v1227_v27 = vadd.f32 %v1226_v25, %v1225_v20  ;;  %v1216_v28 = vadd.f32 %v1215_v7, %v1214_v26  ;;  %v1946_v46 = vpop.eup %1945  ;;  %v765_v2 = vmul.f32 %v1944_v50, %v2314_v56  ;;  %v1250_v50 = vld [vmem:[%s2563_s7 + $0x10] sm:$0xff] }
 0x257   : > { %v1948_v51 = vpop.eup %1947  ;;  %v767_v3 = vmul.f32 %v1946_v46, %v2314_v56 }
 0x258   : > { %v1212_v30 = vrot.slane %v1211_v42, 1  ;;  %v1228_v31 = vrot.slane %v1227_v27, 2  ;;  %v1217_v32 = vrot.slane %v1216_v28, 4  ;;  %v1950_v54 = vpop.eup %1949  ;;  %v768_v13 = vmul.f32 %v1948_v51, %v2314_v56 }
 0x259   : > { %v1952_v53 = vpop.eup %1951  ;;  %v766_v8 = vmul.f32 %v1950_v54, %v2314_v56 }
 0x25a   : > { %v1213_v34 = vadd.f32 %v1212_v30, %v1211_v42  ;;  %v1229_v35 = vadd.f32 %v1228_v31, %v1227_v27  ;;  %v1218_v36 = vadd.f32 %v1217_v32, %v1216_v28  ;;  %v1954_v55 = vpop.eup %1953  ;;  %v769_v15 = vmul.f32 %v1952_v53, %v2314_v56 }
 0x25b   : > { %v1956_v52 = vpop.eup %1955  ;;  %v770_v16 = vmul.f32 %v1954_v55, %v2314_v56 }
 0x25c   : > { %1957 = vrcp.f32 %v1213_v34  ;;  %v1230_v38 = vrot.slane %v1229_v35, 1  ;;  %v1219_v39 = vrot.slane %v1218_v36, 2  ;;  %v771_v18 = vmul.f32 %v1956_v52, %v2314_v56 }
 0x25d   : > { %1959 = vtanh.f32 %v748_v33 }
 0x25e   : > { %1961 = vtanh.f32 %v749_v48  ;;  %v1231_v41 = vadd.f32 %v1230_v38, %v1229_v35  ;;  %v1220_v43 = vadd.f32 %v1219_v39, %v1218_v36  ;;  %v1252_v35 = vld [vmem:[%s2563_s7 + $0x20] sm:$0xff]  ;;  %v1253_v36 = vld [vmem:[%s2563_s7 + $0x28] sm:$0xff] }
 0x25f   : > { %1963 = vtanh.f32 %v750_v37 }
 0x260   : > { %1965 = vrcp.f32 %v1231_v41  ;;  %v1221_v45 = vrot.slane %v1220_v43, 1 }
 0x261   : > { %1967 = vtanh.f32 %v751_v40 }
 0x262   : > { %v1222_v49 = vadd.f32 %v1221_v45, %v1220_v43  ;;  %1969 = vtanh.f32 %v747_v44  ;;  %v1251_v45 = vld [vmem:[%s2563_s7 + $0x18] sm:$0xff] }
 0x264   : > { %1971 = vrcp.f32 %v1222_v49 }
 0x269   : > { %v1958_v57 = vpop.eup %1957 }
 0x26a   : > { %v1960_v59 = vpop.eup %1959  ;;  %v1233_v60 = vmul.f32 %v1958_v57, %v2268_v63  ;;  %v1234_v61 = vmul.f32 %v1958_v57, %v2270_v1  ;;  %v1248_v63 = vld [vmem:[%s2563_s7] sm:$0xff]  ;;  %v1249_v1 = vld [vmem:[%s2563_s7 + $0x8] sm:$0xff] }
 0x26b   : > { %v1962_v62 = vpop.eup %1961  ;;  %v773_v5 = vmul.f32 %v1960_v59, %v2314_v56 }
 0x26c   : > { %v1964_v6 = vpop.eup %1963  ;;  %v1242_v10 = vmul.f32 %v2317_v58, %v1233_v60  ;;  %v1243_v12 = vmul.f32 %v2317_v58, %v1234_v61  ;;  %v774_v25 = vmul.f32 %v1962_v62, %v2314_v56 }
 0x26d   : > { %v1966_v14 = vpop.eup %1965  ;;  %v775_v31 = vmul.f32 %v1964_v6, %v2314_v56 }
 0x26e   : > { %v1968_v19 = vpop.eup %1967  ;;  %v1254_v20 = vadd.f32 %v1242_v10, %v765_v2  ;;  %v1255_v4 = vadd.f32 %v1243_v12, %v766_v8  ;;  %v1256_v23 = vadd.f32 %v1242_v10, %v767_v3  ;;  %v1257_v24 = vadd.f32 %v1243_v12, %v768_v13  ;;  %v1304_v2 = vld [vmem:[%s2358_s15 + $0x8] sm:$0xf]  ;;  %v1305_v3 = vld [vmem:[%s2358_s15 + $0xc] sm:$0xf]  ;;  %v1306_v10 = vld [vmem:[%s2358_s15 + $0x10] sm:$0xf] }
 0x26f   : > { %v1239_v26 = vmul.f32 %v1966_v14, %v2276_v9  ;;  %v1240_v47 = vmul.f32 %v1966_v14, %v2280_v11  ;;  %v1970_v7 = vpop.eup %1969  ;;  %v776_v32 = vmul.f32 %v1968_v19, %v2314_v56  ;;  %v1307_v12 = vld [vmem:[%s2358_s15 + $0x14] sm:$0xf] }
 0x270   : > { %v1266_v42 = vadd.f32 %v1254_v20, %v1248_v63  ;;  %v1267_v27 = vadd.f32 %v1255_v4, %v1249_v1  ;;  %1278 = vst.msk [vmem:[%s2343_s27] sm:$0xff] %vm1159_vm5, %v1254_v20  ;;  %1279 = vst.msk [vmem:[%s2343_s27 + $0x8] sm:$0xff] %vm1159_vm5, %v1255_v4  ;;  %v1268_v28 = vadd.f32 %v1256_v23, %v1248_v63 }
 0x271   : > { %v1269_v17 = vadd.f32 %v1257_v24, %v1249_v1  ;;  %1280 = vst.msk [vmem:[%s2343_s27 + $0x10] sm:$0xff] %vm1159_vm5, %v1256_v23  ;;  %1281 = vst.msk [vmem:[%s2343_s27 + $0x18] sm:$0xff] %vm1159_vm5, %v1257_v24  ;;  %v1972_v9 = vpop.eup %1971  ;;  %v1246_v11 = vmul.f32 %v2317_v58, %v1239_v26  ;;  %v1247_v30 = vmul.f32 %v2317_v58, %v1240_v47 }
 0x272   : > { %1290 = vst.msk [vmem:[%s2366_s19] sm:$0xff] %vm1159_vm5, %v1266_v42  ;;  %1291 = vst.msk [vmem:[%s2366_s19 + $0x8] sm:$0xff] %vm1159_vm5, %v1267_v27  ;;  %v1308_v33 = vpack.c.bf16 %v1267_v27, %v1266_v42  ;;  %v1236_v29 = vmul.f32 %v1972_v9, %v2290_v21  ;;  %v1237_v34 = vmul.f32 %v1972_v9, %v2293_v22  ;;  %v1302_v21 = vld [vmem:[%s2358_s15] sm:$0xf]  ;;  %v1303_v22 = vld [vmem:[%s2358_s15 + $0x4] sm:$0xf] }
 0x273   : > { %1292 = vst.msk [vmem:[%s2366_s19 + $0x10] sm:$0xff] %vm1159_vm5, %v1268_v28  ;;  %1293 = vst.msk [vmem:[%s2366_s19 + $0x18] sm:$0xff] %vm1159_vm5, %v1269_v17  ;;  %v1309_v48 = vpack.c.bf16 %v1269_v17, %v1268_v28  ;;  %v1262_v37 = vadd.f32 %v1246_v11, %v773_v5  ;;  %v1263_v38 = vadd.f32 %v1247_v30, %v774_v25  ;;  %s2070_s15 = smov [#allocation4]  }
 0x274   : > { %v1264_v39 = vadd.f32 %v1246_v11, %v775_v31  ;;  %v1265_v40 = vadd.f32 %v1247_v30, %v776_v32  ;;  %1840 = vmatpush3.bf16.msra.mxu1 %v1308_v33  ;;  %v1244_v41 = vmul.f32 %v2317_v58, %v1236_v29  ;;  %v1245_v43 = vmul.f32 %v2317_v58, %v1237_v34  ;;  %s1977_s2 = sshll.u32 %s2070_s15, 4  ;;  %s1978_s2 = int_to_ptr.vmem [resolvable:$false] %s1977_s2 }
 0x275   : > { %1846 = vmatpush3.bf16.msra.mxu0 %v1309_v48  ;;  %v772_v44 = vmul.f32 %v1970_v7, %v2314_v56  ;;  %1851 = vmatprep.subr.bf16.mxu1 %v2065_v0  ;;  %v1274_v46 = vadd.f32 %v1262_v37, %v1252_v35  ;;  %v1275_v49 = vadd.f32 %v1263_v38, %v1253_v36  ;;  %p1980_p0 = scmp.lt.s32.totalorder %s2451_s26, %s1978_s2 }
 0x276   : > { %1857 = vmatprep.subr.bf16.mxu0 %v2065_v0  ;;  %1286 = vst.msk [vmem:[%s2343_s27 + $0x40] sm:$0xff] %vm1159_vm5, %v1262_v37  ;;  %1287 = vst.msk [vmem:[%s2343_s27 + $0x48] sm:$0xff] %vm1159_vm5, %v1263_v38  ;;  %v1276_v51 = vadd.f32 %v1264_v39, %v1252_v35  ;;  %v1258_v54 = vadd.f32 %v1244_v41, %v769_v15  ;;  %v1259_v53 = vadd.f32 %v1245_v43, %v770_v16 }
 0x277   : > { %1288 = vst.msk [vmem:[%s2343_s27 + $0x50] sm:$0xff] %vm1159_vm5, %v1264_v39  ;;  %1289 = vst.msk [vmem:[%s2343_s27 + $0x58] sm:$0xff] %vm1159_vm5, %v1265_v40  ;;  %v1260_v55 = vadd.f32 %v1244_v41, %v771_v18  ;;  %v1261_v52 = vadd.f32 %v1245_v43, %v772_v44  ;;  %1842 = vmatmul.mubr.msk.bf16.vlgmr.msra.gmra.mxu1 %vm1159_vm5, %v1302_v21  ;;  %v1277_v56 = vadd.f32 %v1265_v40, %v1253_v36 }
 0x278   : > { %1848 = vmatmul.mubr.msk.bf16.vlgmr.msra.gmra.mxu0 %vm1159_vm5, %v1303_v22  ;;  %1298 = vst.msk [vmem:[%s2366_s19 + $0x40] sm:$0xff] %vm1159_vm5, %v1274_v46  ;;  %1299 = vst.msk [vmem:[%s2366_s19 + $0x48] sm:$0xff] %vm1159_vm5, %v1275_v49  ;;  %v1270_v57 = vadd.f32 %v1258_v54, %v1250_v50  ;;  %v1271_v58 = vadd.f32 %v1259_v53, %v1251_v45  ;;  %1853 = vmatprep.mubr.msk.bf16.mxu1 %vm2066_vm0, %v2065_v0 }
 0x279   : > { %1300 = vst.msk [vmem:[%s2366_s19 + $0x50] sm:$0xff] %vm1159_vm5, %v1276_v51  ;;  %1282 = vst.msk [vmem:[%s2343_s27 + $0x20] sm:$0xff] %vm1159_vm5, %v1258_v54  ;;  %v1272_v59 = vadd.f32 %v1260_v55, %v1250_v50  ;;  %v1273_v60 = vadd.f32 %v1261_v52, %v1251_v45  ;;  %1859 = vmatprep.mubr.msk.bf16.mxu0 %vm2066_vm0, %v2065_v0  ;;  %v1312_v6 = vpack.c.bf16 %v1275_v49, %v1274_v46 }
 0x27a   : > { %1283 = vst.msk [vmem:[%s2343_s27 + $0x28] sm:$0xff] %vm1159_vm5, %v1259_v53  ;;  %1284 = vst.msk [vmem:[%s2343_s27 + $0x30] sm:$0xff] %vm1159_vm5, %v1260_v55  ;;  %v1310_v61 = vpack.c.bf16 %v1271_v58, %v1270_v57  ;;  %v1313_v8 = vpack.c.bf16 %v1277_v56, %v1276_v51 }
 0x27b   : > { %1285 = vst.msk [vmem:[%s2343_s27 + $0x38] sm:$0xff] %vm1159_vm5, %v1261_v52  ;;  %1301 = vst.msk [vmem:[%s2366_s19 + $0x58] sm:$0xff] %vm1159_vm5, %v1277_v56  ;;  %v1311_v62 = vpack.c.bf16 %v1273_v60, %v1272_v59  ;;  %s1979_s27 = scalar_lea.vmem %s1978_s2, 3072 }
 0x27c   : > { %1294 = vst.msk [vmem:[%s2366_s19 + $0x20] sm:$0xff] %vm1159_vm5, %v1270_v57  ;;  %1295 = vst.msk [vmem:[%s2366_s19 + $0x28] sm:$0xff] %vm1159_vm5, %v1271_v58  ;;  %1852 = vmatpush3.bf16.msra.mxu1 %v1310_v61  ;;  %p1981_p1 = scmp.lt.s32.totalorder %s1979_s27, %s1973_s18 }
 0x27d   : > { %1296 = vst.msk [vmem:[%s2366_s19 + $0x30] sm:$0xff] %vm1159_vm5, %v1272_v59  ;;  %1297 = vst.msk [vmem:[%s2366_s19 + $0x38] sm:$0xff] %vm1159_vm5, %v1273_v60  ;;  %1858 = vmatpush3.bf16.msra.mxu0 %v1311_v62  ;;  %1863 = vmatprep.subr.bf16.mxu1 %v2065_v0 }
 0x27e   : > { %1869 = vmatprep.subr.bf16.mxu0 %v2065_v0  ;;  %p1982_p2 = por %p1981_p1, %p1980_p0 }
 0x27f   : > { %1854 = vmatmul.mubr.msk.bf16.vlgmr.msra.gmra.mxu1 %vm1159_vm5, %v1304_v2 }
 0x280   : > { %1860 = vmatmul.mubr.msk.bf16.vlgmr.msra.gmra.mxu0 %vm1159_vm5, %v1305_v3  ;;  %1864 = vmatpush3.bf16.msra.mxu1 %v1312_v6  ;;  %p1983_p3 = pnand %p1982_p2, %p1976_p13 }
 0x281   : > { %1870 = vmatpush3.bf16.msra.mxu0 %v1313_v8  ;;  %1865 = vmatprep.mubr.msk.bf16.mxu1 %vm2066_vm0, %v2065_v0 }
 0x282   : > { %1871 = vmatprep.mubr.msk.bf16.mxu0 %vm2066_vm0, %v2065_v0 }
 0x287   : > { %1866 = vmatmul.mubr.msk.bf16.vlgmr.msra.gmra.mxu1 %vm1159_vm5, %v1306_v10 }
 0x288   : > { %1872 = vmatmul.mubr.msk.bf16.vlgmr.msra.gmra.mxu0 %vm1159_vm5, %v1307_v12 }
 0x289   : > { %1986 = shalt.err (!%p1983_p3)
}
 0x28a   : > { %s1987_s12 = scalar_lea.hbm %s2458_s17, 1536  ;;  %s1991_s15 = scalar_lea.hbm %s2566_s10, 3072 }
 0x28b   : > { %p1988_p4 = scmp.ne.s32.totalorder %s2458_s17, %s1987_s12  ;;  %p1992_p9 = scmp.lt.s32.totalorder %s2458_s17, %s2566_s10 }
 0x28c   : > { %p1993_p10 = scmp.lt.s32.totalorder %s1991_s15, %s1987_s12 }
 0x28d   : > { %p1989_p7 = pnand %p1988_p4, %p2178_p5 }
 0x28e   : > { %p1994_p11 = por %p1993_p10, %p1992_p9 }
 0x28f   : > { %p1990_p8 = pneg %p1989_p7 }
 0x291   : > { %p1995_p12 = pnand %p1994_p11, %p1990_p8 }
 0x293   : > { %1998 = shalt.err (!%p1995_p12)
}
 0x294   : > { %s2071_s2 = smov 128   ;;  %s2072_s18 = smov 8  }
 0x295   : > { %s2580_s3 = scalar_lea.sflag [#allocation5], %s2312_s16  ;;  %s2581_s1 = smul.u32 1536, %s2161_s0 }
 0x296   : > { %1879 = dma.vmem_to_hbm [thread:$0]  (%p2178_p5), %s2451_s26, 1536, %s2458_s17, %s2580_s3, %s2071_s2, %s2071_s2, %s2072_s18  }
 0x297   : > { %s2491_s12 = scalar_lea.hbm %s2567_s11, %s2581_s1  ;;  %s1628_s13 = sshll.u32 %s2366_s19, 4  ;;  %s2494_s13 = int_to_ptr.vmem [resolvable:$true] %s1628_s13 }
 0x298   : > { %s1596_s15 = scalar_lea.sflag [#allocation7], %s2312_s16  ;;  %s1999_s4 = scalar_lea.vmem %s2494_s13, 1536 }
 0x299   : > { %p2000_p13 = scmp.ne.s32.totalorder %s2494_s13, %s1999_s4  ;;  %s2073_s5 = smov [#allocation6]  }
 0x29a   : > { %s2003_s26 = sshll.u32 %s2073_s5, 4  ;;  %s2004_s26 = int_to_ptr.vmem [resolvable:$false] %s2003_s26 }
 0x29b   : > { %p2001_p0 = pnand %p2000_p13, %p2178_p5  ;;  %s2005_s0 = scalar_lea.vmem %s2004_s26, 3072 }
 0x29c   : > { %p2006_p2 = scmp.lt.s32.totalorder %s2494_s13, %s2004_s26  ;;  %p2007_p3 = scmp.lt.s32.totalorder %s2005_s0, %s1999_s4 }
 0x29d   : > { %p2002_p1 = pneg %p2001_p0 }
 0x29e   : > { %p2008_p4 = por %p2007_p3, %p2006_p2 }
 0x2a0   : > { %p2009_p7 = pnand %p2008_p4, %p2002_p1 }
 0x2a2   : > { %2012 = shalt.err (!%p2009_p7)
}
 0x2a3   : > { %s2013_s19 = scalar_lea.hbm %s2491_s12, 1536  ;;  %s2017_s5 = scalar_lea.hbm %s2567_s11, 3072 }
 0x2a4   : > { %p2014_p8 = scmp.ne.s32.totalorder %s2491_s12, %s2013_s19  ;;  %p2018_p11 = scmp.lt.s32.totalorder %s2491_s12, %s2567_s11 }
 0x2a5   : > { %p2019_p12 = scmp.lt.s32.totalorder %s2017_s5, %s2013_s19 }
 0x2a6   : > { %p2015_p9 = pnand %p2014_p8, %p2178_p5 }
 0x2a7   : > { %p2020_p13 = por %p2019_p12, %p2018_p11 }
 0x2a8   : > { %p2016_p10 = pneg %p2015_p9 }
 0x2aa   : > { %p2021_p0 = pnand %p2020_p13, %p2016_p10 }
 0x2ac   : > { %2024 = shalt.err (!%p2021_p0)
}
 0x2ad   : > { %1880 = dma.vmem_to_hbm [thread:$0]  (%p2178_p5), %s2494_s13, 1536, %s2491_s12, %s1596_s15, %s2071_s2, %s2071_s2, %s2072_s18   ;;  %vm1578_vm6 = vcmask 125952  }
 0x2ae   : > { %s2582_s4 = smul.u32 24, %s2195_s14 }
 0x2b0   : > { %s2525_s26 = scalar_lea.vmem %s2565_s9, %s2582_s4 }
 0x337   : > { %v1351_v0 = vpop.f32.mrf.mxu1 }
 0x338   : > { %v1394_v13 = vpop.f32.mrf.mxu0  ;;  %v1572_v14 = vpack.c.bf16 %v1351_v0, %v1351_v0 }
 0x339   : > { %v1573_v63 = vpack.c.bf16 %v1394_v13, %v1394_v13  ;;  %v1843_v1 = vpop.f32.mrf.mxu1 }
 0x33a   : > { %v1849_v15 = vpop.f32.mrf.mxu0  ;;  %1579 = vst.msk [vmem:[%s2525_s26] sm:$0xf] %vm1578_vm6, %v1572_v14 }
 0x33b   : > { %1580 = vst.msk [vmem:[%s2525_s26 + $0x4] sm:$0xf] %vm1578_vm6, %v1573_v63  ;;  %v1354_v16 = vpop.f32.mrf.mxu1 }
 0x33c   : > { %v1397_v18 = vpop.f32.mrf.mxu0 }
 0x33d   : > { %v1844_v19 = vpop.f32.mrf.mxu1 }
 0x33e   : > { %v1850_v20 = vpop.f32.mrf.mxu0 }
 0x33f   : > { %v1437_v4 = vpop.f32.mrf.mxu1 }
 0x340   : > { %v1480_v23 = vpop.f32.mrf.mxu0  ;;  %v1574_v24 = vpack.c.bf16 %v1437_v4, %v1437_v4 }
 0x341   : > { %v1575_v5 = vpack.c.bf16 %v1480_v23, %v1480_v23  ;;  %v1855_v25 = vpop.f32.mrf.mxu1 }
 0x342   : > { %v1861_v26 = vpop.f32.mrf.mxu0  ;;  %1581 = vst.msk [vmem:[%s2525_s26 + $0x8] sm:$0xf] %vm1578_vm6, %v1574_v24 }
 0x343   : > { %1582 = vst.msk [vmem:[%s2525_s26 + $0xc] sm:$0xf] %vm1578_vm6, %v1575_v5  ;;  %v1440_v47 = vpop.f32.mrf.mxu1 }
 0x344   : > { %v1483_v7 = vpop.f32.mrf.mxu0 }
 0x345   : > { %v1856_v42 = vpop.f32.mrf.mxu1 }
 0x346   : > { %v1862_v27 = vpop.f32.mrf.mxu0 }
 0x347   : > { %v1523_v28 = vpop.f32.mrf.mxu1 }
 0x348   : > { %v1566_v17 = vpop.f32.mrf.mxu0  ;;  %v1576_v9 = vpack.c.bf16 %v1523_v28, %v1523_v28 }
 0x349   : > { %v1577_v11 = vpack.c.bf16 %v1566_v17, %v1566_v17  ;;  %v1867_v30 = vpop.f32.mrf.mxu1 }
 0x34a   : > { %v1873_v31 = vpop.f32.mrf.mxu0  ;;  %1583 = vst.msk [vmem:[%s2525_s26 + $0x10] sm:$0xf] %vm1578_vm6, %v1576_v9 }
 0x34b   : > { %1584 = vst.msk [vmem:[%s2525_s26 + $0x14] sm:$0xf] %vm1578_vm6, %v1577_v11  ;;  %v1526_v32 = vpop.f32.mrf.mxu1 }
 0x34c   : > { %v1569_v33 = vpop.f32.mrf.mxu0 }
 0x34d   : > { %v1868_v48 = vpop.f32.mrf.mxu1 }
 0x34e   : > { %v1874_v29 = vpop.f32.mrf.mxu0 }
 0x34f PF: > { %p1890_p5 = scmp.ge.s32.totalorder %s2063_s24, 2  ;;  %s1651_s29 = sand.u32 1, %s2051_s21  }
 0x350   : > { %s1652_s14 = scalar_lea.sflag [#allocation5], %s1651_s29 }
 0x351   : > { %p1884_p1 = pnand %p1890_p5, %p2182_p6 }
 0x353   : > { %p1885_p2 = pneg %p1884_p1 }
 0x355   : > { %2042 = dma.done.wait (%p1885_p2), %s1652_s14, 1536  }
 0x356   : > { %2044 = vsyncadd (%p1885_p2), %s1652_s14, 4294965760  ;;  %s1661_s2 = scalar_lea.sflag [#allocation7], %s1651_s29 }
 0x357   : > { %2046 = dma.done.wait (%p1885_p2), %s1661_s2, 1536  }
 0x358   : > { %2048 = vsyncadd (%p1885_p2), %s1661_s2, 4294965760  ;;  %p27_p3 = scmp.ge.s32.totalorder %s2165_s25, 4   ;;  %s2583_s21 = smov %s2055_s22 }
 0x359   : > { %s2584_s22 = smov %s2059_s23  ;;  %s2585_s23 = smov %s2176_s28 }
 0x35a   : > { %s2586_s24 = smov %s2165_s25  ;;  %29 = sbr.rel (!%p27_p3) target bundleno = 12 (0xc), region = 123 }
 0x35f   :  { %1666 = vsyncpa [#allocation5], 1 }
 0x360   :  { %1668 = vsyncpa [#allocation5 + $0x1], 1 }
 0x361   :  { %1669 = vsyncpa [#allocation7], 1 }
 0x362   :  { %1671 = vsyncpa [#allocation7 + $0x1], 1 }

</bundles_post_ra>
